<compile_context>
chip_gen: v6e
topology: v6e:2x2x1
jax: 0.10.0
libtpu: 0.0.40
codegen_flags: <defaults>
</compile_context>

<pallas_src>
import jax
import jax.numpy as jnp
import numpy as np
from jax.experimental import pallas as pl
from jax.experimental.pallas import tpu as pltpu

# ---------------- model hyper-parameters (small example sizes) ----------------
D_MODEL = 32
NHEAD = 4
HEAD_DIM = D_MODEL // NHEAD
DIM_FF = 64
NUM_LAYERS = 2
SEQ_TGT = 8        # number of object queries (tgt length)
SEQ_MEM = 16       # memory (encoder output) length
BATCH = 2
EPS = 1e-5         # nn.LayerNorm default
ATT_SCALE = 1.0 / float(np.sqrt(HEAD_DIM))

# ---------------- packed-parameter layout tables ----------------
# Weight slab per layer: (W_ROWS, W_LANES) bf16, one matrix per ROW segment
# (sublane-stacked => every slice starts at lane 0; row offsets are multiples
# of 16 so bf16 sublane packing stays aligned).
W_LANES = max(D_MODEL, DIM_FF)                      # 64
W_SEGS = [  # (name, rows=d_in, cols=d_out)
    ("sa_q", D_MODEL, D_MODEL),
    ("sa_k", D_MODEL, D_MODEL),
    ("sa_v", D_MODEL, D_MODEL),
    ("sa_o", D_MODEL, D_MODEL),
    ("ca_q", D_MODEL, D_MODEL),
    ("ca_k", D_MODEL, D_MODEL),
    ("ca_v", D_MODEL, D_MODEL),
    ("ca_o", D_MODEL, D_MODEL),
    ("ff1", D_MODEL, DIM_FF),
    ("ff2", DIM_FF, D_MODEL),
]
W_OFFS = {}
_r = 0
for _name, _din, _dout in W_SEGS:
    W_OFFS[_name] = (_r, _din, _dout)
    _r += _din
W_ROWS = _r                                          # 352 (multiple of 16)

# Vector slab per layer: (16, W_LANES) f32; one bias / LayerNorm vector per row.
VEC_ROWS = ["sa_bq", "sa_bk", "sa_bv", "sa_bo",
            "ca_bq", "ca_bk", "ca_bv", "ca_bo",
            "b1", "b2",
            "ln1_g", "ln1_b", "ln2_g", "ln2_b", "ln3_g", "ln3_b"]
VEC_WIDTH = {"b1": DIM_FF}


# ---------------- Pallas kernel + wrapper ----------------
def transformer_decoder_pallas(tgt, memory, query_pos, pos,
                               w_slab, vec_slab, lnf, nhead=NHEAD):
    """tgt/query_pos: (SQ, B, D); memory/pos: (SM, B, D); returns (1, SQ, B, D)."""
    SQ, B, D = tgt.shape
    SM = memory.shape[0]
    L = w_slab.shape[0]
    DH = D // nhead
    BSQ, BSM = B * SQ, B * SM

    def kernel(tgt_ref, qpos_ref, mem_ref, memk_ref,
               w_ref, vec_ref, lnf_ref,
               out_ref,
               x_scr):
        layer = pl.program_id(1)             # grid = (batch_chunk, layer)

        @pl.when(layer == 0)
        def _init():
            x_scr[...] = tgt_ref[...]        # running activation for this chunk

        w = w_ref[0]                         # (W_ROWS, W_LANES)  bf16 weights
        vec = vec_ref[0]                     # (16, W_LANES)      f32 biases/LN

        def wseg(name):
            r0, din, dout = W_OFFS[name]
            return w[r0:r0 + din, 0:dout]

        def vrow(name):
            r = VEC_ROWS.index(name)
            n = VEC_WIDTH.get(name, D)
            return vec[r:r + 1, 0:n]

        def bf(a):
            return a.astype(jnp.bfloat16)

        def layer_norm(y, g, b):
            # single-pass stats are fine for O(1) f32 activations
            mu = jnp.mean(y, axis=-1, keepdims=True)
            ms = jnp.mean(y * y, axis=-1, keepdims=True)
            var = ms - mu * mu
            return (y - mu) * jax.lax.rsqrt(var + EPS) * g + b

        def softmax_last(s):
            m = jnp.max(s, axis=-1, keepdims=True)
            e = jnp.exp(s - m)
            denom = jnp.sum(e, axis=-1, keepdims=True)
            return e * pl.reciprocal(denom, approx=True)    # EUP slot

        def proj(a_bf, wname, bname):
            # bf16 x bf16 -> f32 accumulation, f32 bias add
            return (jnp.dot(a_bf, wseg(wname),
                            preferred_element_type=jnp.float32) + vrow(bname))

        def mha(q, k, v, kv_len):
            # q: (SQ, D) f32; k, v: (kv_len, D) f32 (one batch element per chunk)
            q3 = bf(q).reshape(1, SQ, D)
            k3 = bf(k).reshape(1, kv_len, D)
            v3 = bf(v).reshape(1, kv_len, D)
            outs = []
            for h in range(nhead):
                sl = slice(h * DH, (h + 1) * DH)
                s = jnp.einsum('bqd,bkd->bqk', q3[:, :, sl], k3[:, :, sl],
                               preferred_element_type=jnp.float32) * ATT_SCALE
                p = softmax_last(s)
                outs.append(jnp.einsum('bqk,bkd->bqd', bf(p), v3[:, :, sl],
                                       preferred_element_type=jnp.float32))
            # lane-concatenate per-head contexts (no masked scratch stores)
            return jnp.concatenate(outs, axis=-1).reshape(SQ, D)

        x = x_scr[...]                       # (SQ, D) f32
        qpos = qpos_ref[...]

        # ---- self-attention: q = k = x + query_pos, value = x ----
        q_in_bf = bf(x + qpos)
        x_bf = bf(x)
        q_sa = proj(q_in_bf, "sa_q", "sa_bq")
        k_sa = proj(q_in_bf, "sa_k", "sa_bk")
        v_sa = proj(x_bf, "sa_v", "sa_bv")
        ctx = mha(q_sa, k_sa, v_sa, SQ)
        attn = proj(bf(ctx), "sa_o", "sa_bo")
        x = layer_norm(x + attn, vrow("ln1_g"), vrow("ln1_b"))

        # ---- cross-attention: q = x + query_pos, k = memory + pos, v = memory ----
        q_ca = proj(bf(x + qpos), "ca_q", "ca_bq")
        k_ca = proj(bf(memk_ref[...]), "ca_k", "ca_bk")
        v_ca = proj(bf(mem_ref[...]), "ca_v", "ca_bv")
        ctx2 = mha(q_ca, k_ca, v_ca, SM)
        attn2 = proj(bf(ctx2), "ca_o", "ca_bo")
        x = layer_norm(x + attn2, vrow("ln2_g"), vrow("ln2_b"))

        # ---- feed-forward: linear1 -> relu -> linear2 ----
        h1 = jnp.maximum(proj(bf(x), "ff1", "b1"), 0.0)
        ff = proj(bf(h1), "ff2", "b2")
        x = layer_norm(x + ff, vrow("ln3_g"), vrow("ln3_b"))

        x_scr[...] = x                       # carry to next layer (stays in VMEM)

        @pl.when(layer == pl.num_programs(1) - 1)
        def _finalize():
            # final decoder norm (self.norm), then write this chunk's output
            out_ref[...] = layer_norm(x, lnf_ref[0:1, :], lnf_ref[1:2, :])

    # ---- wrapper-side layout: seq-first -> batch-first, batch flattened to rows ----
    tgt_f = jnp.transpose(tgt, (1, 0, 2)).reshape(BSQ, D)
    qpos_f = jnp.transpose(query_pos, (1, 0, 2)).reshape(BSQ, D)
    mem_f = jnp.transpose(memory, (1, 0, 2)).reshape(BSM, D)
    memk_f = jnp.transpose(memory + pos, (1, 0, 2)).reshape(BSM, D)   # K input, wrapper-side

    grid = (B, L)   # (batch chunk, layer); layer is the fastest axis

    in_specs = [
        pl.BlockSpec((SQ, D), lambda c, l: (c, 0)),                    # tgt (per chunk)
        pl.BlockSpec((SQ, D), lambda c, l: (c, 0)),                    # query_pos
        pl.BlockSpec((SM, D), lambda c, l: (c, 0)),                    # memory
        pl.BlockSpec((SM, D), lambda c, l: (c, 0)),                    # memory + pos
        pl.BlockSpec((1, W_ROWS, W_LANES), lambda c, l: (l, 0, 0)),    # weight slab
        pl.BlockSpec((1, len(VEC_ROWS), W_LANES), lambda c, l: (l, 0, 0)),  # vec slab
        pl.BlockSpec((2, D), lambda c, l: (0, 0)),                     # final norm
    ]
    out_specs = pl.BlockSpec((SQ, D), lambda c, l: (c, 0))

    out_flat = pl.pallas_call(
        kernel,
        out_shape=jax.ShapeDtypeStruct((BSQ, D), jnp.float32),
        grid_spec=pltpu.PrefetchScalarGridSpec(
            num_scalar_prefetch=0,
            grid=grid,
            in_specs=in_specs,
            out_specs=out_specs,
            scratch_shapes=[
                pltpu.VMEM((SQ, D), jnp.float32),   # running activation (per chunk)
            ],
        ),
        compiler_params=pltpu.CompilerParams(
            # batch chunks can go to separate TensorCores (v7x); layers are
            # sequential (VMEM-carried activation).
            dimension_semantics=("parallel", "arbitrary"),
            # explicit scoped-VMEM budget (size from the real footprint at
            # production shapes; trivially sufficient at these toy dims).
            vmem_limit_bytes=32 * 1024 * 1024,
        ),
    )(tgt_f, qpos_f, mem_f, memk_f, w_slab, vec_slab, lnf)

    out = out_flat.reshape(B, SQ, D)
    return jnp.transpose(out, (1, 0, 2))[None]       # == output.unsqueeze(0)


# ---------------- parameter construction + packing ----------------
def make_layer_params(key):
    ks = jax.random.split(key, 13)
    s = 0.1

    def lin(k, din, dout):
        kw, kb = jax.random.split(k)
        return (jax.random.normal(kw, (din, dout), jnp.float32) * s,
                jax.random.normal(kb, (dout,), jnp.float32) * s)

    p = {}
    p["sa_wq"], p["sa_bq"] = lin(ks[0], D_MODEL, D_MODEL)
    p["sa_wk"], p["sa_bk"] = lin(ks[1], D_MODEL, D_MODEL)
    p["sa_wv"], p["sa_bv"] = lin(ks[2], D_MODEL, D_MODEL)
    p["sa_wo"], p["sa_bo"] = lin(ks[3], D_MODEL, D_MODEL)
    p["ca_wq"], p["ca_bq"] = lin(ks[4], D_MODEL, D_MODEL)
    p["ca_wk"], p["ca_bk"] = lin(ks[5], D_MODEL, D_MODEL)
    p["ca_wv"], p["ca_bv"] = lin(ks[6], D_MODEL, D_MODEL)
    p["ca_wo"], p["ca_bo"] = lin(ks[7], D_MODEL, D_MODEL)
    p["w1"], p["b1"] = lin(ks[8], D_MODEL, DIM_FF)
    p["w2"], p["b2"] = lin(ks[9], DIM_FF, D_MODEL)
    for i, nm in enumerate(["ln1", "ln2", "ln3"]):
        kg, kb = jax.random.split(ks[10 + i])
        p[nm + "_g"] = 1.0 + 0.1 * jax.random.normal(kg, (D_MODEL,), jnp.float32)
        p[nm + "_b"] = 0.1 * jax.random.normal(kb, (D_MODEL,), jnp.float32)
    return p


def pack_params(layers):
    """Pack per-layer params into (L, W_ROWS, W_LANES) bf16 + (L, 16, W_LANES) f32."""
    w_slabs, vec_slabs = [], []
    mat_key = {"sa_q": "sa_wq", "sa_k": "sa_wk", "sa_v": "sa_wv", "sa_o": "sa_wo",
               "ca_q": "ca_wq", "ca_k": "ca_wk", "ca_v": "ca_wv", "ca_o": "ca_wo",
               "ff1": "w1", "ff2": "w2"}
    for p in layers:
        blocks = []
        for name, din, dout in W_SEGS:
            m = p[mat_key[name]]
            assert m.shape == (din, dout)
            blocks.append(jnp.pad(m, ((0, 0), (0, W_LANES - dout))))
        w_slabs.append(jnp.concatenate(blocks, axis=0).astype(jnp.bfloat16))

        vecs = {"sa_bq": p["sa_bq"], "sa_bk": p["sa_bk"], "sa_bv": p["sa_bv"],
                "sa_bo": p["sa_bo"], "ca_bq": p["ca_bq"], "ca_bk": p["ca_bk"],
                "ca_bv": p["ca_bv"], "ca_bo": p["ca_bo"],
                "b1": p["b1"], "b2": p["b2"],
                "ln1_g": p["ln1_g"], "ln1_b": p["ln1_b"],
                "ln2_g": p["ln2_g"], "ln2_b": p["ln2_b"],
                "ln3_g": p["ln3_g"], "ln3_b": p["ln3_b"]}
        rows = [jnp.pad(vecs[name], (0, W_LANES - vecs[name].shape[0]))[None, :]
                for name in VEC_ROWS]
        vec_slabs.append(jnp.concatenate(rows, axis=0).astype(jnp.float32))
    return jnp.stack(w_slabs), jnp.stack(vec_slabs)


# ---------------- pure-JAX reference (same decoder, mirrored bf16 matmul precision) ----------------
def reference_decoder(tgt, memory, query_pos, pos, layers, lnf_g, lnf_b):
    bf = lambda a: a.astype(jnp.bfloat16)

    def dotf(a, w):
        return jnp.dot(bf(a), bf(w), preferred_element_type=jnp.float32)

    def ln(x, g, b):
        mu = jnp.mean(x, axis=-1, keepdims=True)
        var = jnp.mean((x - mu) ** 2, axis=-1, keepdims=True)
        return (x - mu) / jnp.sqrt(var + EPS) * g + b

    def mha(q_in, k_in, v_in, wq, bq, wk, bk, wv, bv, wo, bo):
        q = dotf(q_in, wq) + bq
        k = dotf(k_in, wk) + bk
        v = dotf(v_in, wv) + bv
        outs = []
        for h in range(NHEAD):
            sl = slice(h * HEAD_DIM, (h + 1) * HEAD_DIM)
            sc = jnp.dot(bf(q[:, sl]), bf(k[:, sl]).T,
                         preferred_element_type=jnp.float32) * ATT_SCALE
            pr = jax.nn.softmax(sc, axis=-1)
            outs.append(jnp.dot(bf(pr), bf(v[:, sl]),
                                preferred_element_type=jnp.float32))
        return dotf(jnp.concatenate(outs, axis=-1), wo) + bo

    def per_batch(x, mem, qp, mp):
        for p in layers:
            sa = mha(x + qp, x + qp, x,
                     p["sa_wq"], p["sa_bq"], p["sa_wk"], p["sa_bk"],
                     p["sa_wv"], p["sa_bv"], p["sa_wo"], p["sa_bo"])
            x = ln(x + sa, p["ln1_g"], p["ln1_b"])
            ca = mha(x + qp, mem + mp, mem,
                     p["ca_wq"], p["ca_bq"], p["ca_wk"], p["ca_bk"],
                     p["ca_wv"], p["ca_bv"], p["ca_wo"], p["ca_bo"])
            x = ln(x + ca, p["ln2_g"], p["ln2_b"])
            h1 = jnp.maximum(dotf(x, p["w1"]) + p["b1"], 0.0)
            ff = dotf(h1, p["w2"]) + p["b2"]
            x = ln(x + ff, p["ln3_g"], p["ln3_b"])
        return ln(x, lnf_g, lnf_b)

    xb = jnp.transpose(tgt, (1, 0, 2))
    mb = jnp.transpose(memory, (1, 0, 2))
    qb = jnp.transpose(query_pos, (1, 0, 2))
    pb = jnp.transpose(pos, (1, 0, 2))
    out = jax.vmap(per_batch)(xb, mb, qb, pb)          # (B, SQ, D)
    return jnp.transpose(out, (1, 0, 2))[None]         # (1, SQ, B, D)


if __name__ == "__main__":
    key = jax.random.PRNGKey(0)
    k_tgt, k_mem, k_qp, k_pos, k_par = jax.random.split(key, 5)

    tgt = jax.random.normal(k_tgt, (SEQ_TGT, BATCH, D_MODEL), jnp.float32)
    memory = jax.random.normal(k_mem, (SEQ_MEM, BATCH, D_MODEL), jnp.float32)
    query_pos = jax.random.normal(k_qp, (SEQ_TGT, BATCH, D_MODEL), jnp.float32)
    pos = jax.random.normal(k_pos, (SEQ_MEM, BATCH, D_MODEL), jnp.float32)

    layer_keys = jax.random.split(k_par, NUM_LAYERS + 1)
    layers = [make_layer_params(layer_keys[i]) for i in range(NUM_LAYERS)]
    kf_g, kf_b = jax.random.split(layer_keys[-1])
    lnf_g = 1.0 + 0.1 * jax.random.normal(kf_g, (D_MODEL,), jnp.float32)
    lnf_b = 0.1 * jax.random.normal(kf_b, (D_MODEL,), jnp.float32)

    w_slab, vec_slab = pack_params(layers)
    lnf = jnp.stack([lnf_g, lnf_b])    # (2, D) f32

    out = transformer_decoder_pallas(tgt, memory, query_pos, pos,
                                     w_slab, vec_slab, lnf)
    out = jax.block_until_ready(out)

    ref = jax.block_until_ready(
        reference_decoder(tgt, memory, query_pos, pos, layers, lnf_g, lnf_b))

    assert out.shape == (1, SEQ_TGT, BATCH, D_MODEL)
    # Reference mirrors the kernel's bf16-operand / f32-accumulate matmul
    # precision; remaining differences are the EUP approximate reciprocal in
    # the kernel softmax and op-ordering rounding -> modest tolerance.
    np.testing.assert_allclose(np.asarray(out), np.asarray(ref),
                               rtol=2e-2, atol=2e-2)

    print("KERNEL_OK")
</pallas_src>

<mosaic_0001>
module attributes {stable_mosaic.version = 11 : i64} {
  func.func @kernel(%arg0: i32, %arg1: i32, %arg2: memref<8x32xf32, #tpu.memory_space<vmem>>, %arg3: memref<8x32xf32, #tpu.memory_space<vmem>>, %arg4: memref<16x32xf32, #tpu.memory_space<vmem>>, %arg5: memref<16x32xf32, #tpu.memory_space<vmem>>, %arg6: memref<1x352x64xbf16, #tpu.memory_space<vmem>>, %arg7: memref<1x16x64xf32, #tpu.memory_space<vmem>>, %arg8: memref<2x32xf32, #tpu.memory_space<vmem>>, %arg9: memref<8x32xf32, #tpu.memory_space<vmem>>, %arg10: memref<8x32xf32, #tpu.memory_space<vmem>>) attributes {dimension_semantics = [#tpu.dimension_semantics<parallel>, #tpu.dimension_semantics<arbitrary>], iteration_bounds = array<i64: 2, 2>, scalar_prefetch = 0 : i64, scratch_operands = 1 : i64, tpu.core_type = #tpu.core_type<tc>, window_params = [{transform_indices = @transform_0, window_bounds = array<i64: 8, 32>}, {transform_indices = @transform_1, window_bounds = array<i64: 8, 32>}, {transform_indices = @transform_2, window_bounds = array<i64: 16, 32>}, {transform_indices = @transform_3, window_bounds = array<i64: 16, 32>}, {transform_indices = @transform_4, window_bounds = array<i64: 1, 352, 64>}, {transform_indices = @transform_5, window_bounds = array<i64: 1, 16, 64>}, {pipeline_mode = #tpu.pipeline_mode<synchronous>, transform_indices = @transform_6, window_bounds = array<i64: 2, 32>}, {transform_indices = @transform_7, window_bounds = array<i64: 8, 32>}]} {
    %c0_i32 = arith.constant 0 : i32
    %0 = arith.cmpi eq, %arg1, %c0_i32 : i32
    %1 = arith.extui %0 : i1 to i32
    %c0_i32_0 = arith.constant 0 : i32
    %2 = arith.cmpi ne, %1, %c0_i32_0 : i32
    scf.if %2 {
      %c0_82 = arith.constant 0 : index
      %c0_83 = arith.constant 0 : index
      %313 = vector.load %arg2[%c0_82, %c0_83] : memref<8x32xf32, #tpu.memory_space<vmem>>, vector<8x32xf32>
      %c0_84 = arith.constant 0 : index
      %c0_85 = arith.constant 0 : index
      %314 = vector.load %arg10[%c0_84, %c0_85] : memref<8x32xf32, #tpu.memory_space<vmem>>, vector<8x32xf32>
      tpu.vector_store %arg10[%c0_84, %c0_85], %313 {strides = array<i32>} : memref<8x32xf32, #tpu.memory_space<vmem>>, vector<8x32xf32>,
    } else {
    }
    %c0 = arith.constant 0 : index
    %c0_1 = arith.constant 0 : index
    %c0_2 = arith.constant 0 : index
    %3 = vector.load %arg6[%c0, %c0_1, %c0_2] : memref<1x352x64xbf16, #tpu.memory_space<vmem>>, vector<1x352x64xbf16>
    %4 = vector.shape_cast %3 : vector<1x352x64xbf16> to vector<352x64xbf16>
    %c0_3 = arith.constant 0 : index
    %c0_4 = arith.constant 0 : index
    %c0_5 = arith.constant 0 : index
    %5 = vector.load %arg7[%c0_3, %c0_4, %c0_5] : memref<1x16x64xf32, #tpu.memory_space<vmem>>, vector<1x16x64xf32>
    %6 = vector.shape_cast %5 : vector<1x16x64xf32> to vector<16x64xf32>
    %c0_6 = arith.constant 0 : index
    %c0_7 = arith.constant 0 : index
    %7 = vector.load %arg10[%c0_6, %c0_7] : memref<8x32xf32, #tpu.memory_space<vmem>>, vector<8x32xf32>
    %c0_8 = arith.constant 0 : index
    %c0_9 = arith.constant 0 : index
    %8 = vector.load %arg3[%c0_8, %c0_9] : memref<8x32xf32, #tpu.memory_space<vmem>>, vector<8x32xf32>
    %9 = arith.addf %7, %8 : vector<8x32xf32>
    %10 = arith.truncf %9 : vector<8x32xf32> to vector<8x32xbf16>
    %11 = arith.truncf %7 : vector<8x32xf32> to vector<8x32xbf16>
    %12 = vector.extract_strided_slice %4 {offsets = [0, 0], sizes = [32, 32], strides = [1, 1]} : vector<352x64xbf16> to vector<32x32xbf16>
    %cst = arith.constant dense<0.000000e+00> : vector<8x32xf32>
    %13 = tpu.matmul %10, %12, %cst {dimension_numbers = #tpu.dot_dimension_numbers<[1], [0], [0], [1], [0, 0, 1, 1], [], []>} : vector<8x32xbf16>, vector<32x32xbf16>, vector<8x32xf32> -> vector<8x32xf32>
    %14 = vector.extract_strided_slice %6 {offsets = [0, 0], sizes = [1, 32], strides = [1, 1]} : vector<16x64xf32> to vector<1x32xf32>
    %15 = vector.broadcast %14 : vector<1x32xf32> to vector<8x32xf32>
    %16 = arith.addf %13, %15 : vector<8x32xf32>
    %17 = vector.extract_strided_slice %4 {offsets = [32, 0], sizes = [32, 32], strides = [1, 1]} : vector<352x64xbf16> to vector<32x32xbf16>
    %cst_10 = arith.constant dense<0.000000e+00> : vector<8x32xf32>
    %18 = tpu.matmul %10, %17, %cst_10 {dimension_numbers = #tpu.dot_dimension_numbers<[1], [0], [0], [1], [0, 0, 1, 1], [], []>} : vector<8x32xbf16>, vector<32x32xbf16>, vector<8x32xf32> -> vector<8x32xf32>
    %19 = vector.extract_strided_slice %6 {offsets = [1, 0], sizes = [1, 32], strides = [1, 1]} : vector<16x64xf32> to vector<1x32xf32>
    %20 = vector.broadcast %19 : vector<1x32xf32> to vector<8x32xf32>
    %21 = arith.addf %18, %20 : vector<8x32xf32>
    %22 = vector.extract_strided_slice %4 {offsets = [64, 0], sizes = [32, 32], strides = [1, 1]} : vector<352x64xbf16> to vector<32x32xbf16>
    %cst_11 = arith.constant dense<0.000000e+00> : vector<8x32xf32>
    %23 = tpu.matmul %11, %22, %cst_11 {dimension_numbers = #tpu.dot_dimension_numbers<[1], [0], [0], [1], [0, 0, 1, 1], [], []>} : vector<8x32xbf16>, vector<32x32xbf16>, vector<8x32xf32> -> vector<8x32xf32>
    %24 = vector.extract_strided_slice %6 {offsets = [2, 0], sizes = [1, 32], strides = [1, 1]} : vector<16x64xf32> to vector<1x32xf32>
    %25 = vector.broadcast %24 : vector<1x32xf32> to vector<8x32xf32>
    %26 = arith.addf %23, %25 : vector<8x32xf32>
    %27 = arith.truncf %16 : vector<8x32xf32> to vector<8x32xbf16>
    %28 = vector.shape_cast %27 : vector<8x32xbf16> to vector<1x8x32xbf16>
    %29 = arith.truncf %21 : vector<8x32xf32> to vector<8x32xbf16>
    %30 = vector.shape_cast %29 : vector<8x32xbf16> to vector<1x8x32xbf16>
    %31 = arith.truncf %26 : vector<8x32xf32> to vector<8x32xbf16>
    %32 = vector.shape_cast %31 : vector<8x32xbf16> to vector<1x8x32xbf16>
    %33 = vector.extract_strided_slice %28 {offsets = [0, 0, 0], sizes = [1, 8, 8], strides = [1, 1, 1]} : vector<1x8x32xbf16> to vector<1x8x8xbf16>
    %34 = vector.extract_strided_slice %30 {offsets = [0, 0, 0], sizes = [1, 8, 8], strides = [1, 1, 1]} : vector<1x8x32xbf16> to vector<1x8x8xbf16>
    "tpu.trace_start"() <{level = 10 : i32, message = "bqd,bkd->bqk"}> : () -> ()
    %cst_12 = arith.constant dense<0.000000e+00> : vector<1x8x8xf32>
    %35 = tpu.matmul %33, %34, %cst_12 {dimension_numbers = #tpu.dot_dimension_numbers<[2], [2], [1], [1], [0, 0, 0, 1, 1, 1], [0], [0]>} : vector<1x8x8xbf16>, vector<1x8x8xbf16>, vector<1x8x8xf32> -> vector<1x8x8xf32>
    "tpu.trace_stop"() : () -> ()
    %cst_13 = arith.constant 0.353553385 : f32
    %36 = vector.broadcast %cst_13 : f32 to vector<1x8x8xf32>
    %37 = arith.mulf %35, %36 : vector<1x8x8xf32>
    %cst_14 = arith.constant dense<0xFF800000> : vector<1x8xf32>
    %38 = vector.multi_reduction <maximumf>, %37, %cst_14 [2] : vector<1x8x8xf32> to vector<1x8xf32>
    %39 = vector.shape_cast %38 : vector<1x8xf32> to vector<1x8x1xf32>
    %40 = vector.broadcast %39 : vector<1x8x1xf32> to vector<1x8x8xf32>
    %41 = arith.subf %37, %40 : vector<1x8x8xf32>
    %42 = math.exp %41 : vector<1x8x8xf32>
    %cst_15 = arith.constant dense<0.000000e+00> : vector<1x8xf32>
    %43 = vector.multi_reduction <add>, %42, %cst_15 [2] : vector<1x8x8xf32> to vector<1x8xf32>
    %44 = vector.shape_cast %43 : vector<1x8xf32> to vector<1x8x1xf32>
    %45 = tpu.reciprocal %44 {approx = true} : vector<1x8x1xf32> -> vector<1x8x1xf32>
    %46 = vector.broadcast %45 : vector<1x8x1xf32> to vector<1x8x8xf32>
    %47 = arith.mulf %42, %46 : vector<1x8x8xf32>
    %48 = arith.truncf %47 : vector<1x8x8xf32> to vector<1x8x8xbf16>
    %49 = vector.extract_strided_slice %32 {offsets = [0, 0, 0], sizes = [1, 8, 8], strides = [1, 1, 1]} : vector<1x8x32xbf16> to vector<1x8x8xbf16>
    "tpu.trace_start"() <{level = 10 : i32, message = "bqk,bkd->bqd"}> : () -> ()
    %cst_16 = arith.constant dense<0.000000e+00> : vector<1x8x8xf32>
    %50 = tpu.matmul %48, %49, %cst_16 {dimension_numbers = #tpu.dot_dimension_numbers<[2], [1], [1], [2], [0, 0, 0, 1, 1, 2], [0], [0]>} : vector<1x8x8xbf16>, vector<1x8x8xbf16>, vector<1x8x8xf32> -> vector<1x8x8xf32>
    "tpu.trace_stop"() : () -> ()
    %51 = vector.extract_strided_slice %28 {offsets = [0, 0, 8], sizes = [1, 8, 8], strides = [1, 1, 1]} : vector<1x8x32xbf16> to vector<1x8x8xbf16>
    %52 = vector.extract_strided_slice %30 {offsets = [0, 0, 8], sizes = [1, 8, 8], strides = [1, 1, 1]} : vector<1x8x32xbf16> to vector<1x8x8xbf16>
    "tpu.trace_start"() <{level = 10 : i32, message = "bqd,bkd->bqk"}> : () -> ()
    %cst_17 = arith.constant dense<0.000000e+00> : vector<1x8x8xf32>
    %53 = tpu.matmul %51, %52, %cst_17 {dimension_numbers = #tpu.dot_dimension_numbers<[2], [2], [1], [1], [0, 0, 0, 1, 1, 1], [0], [0]>} : vector<1x8x8xbf16>, vector<1x8x8xbf16>, vector<1x8x8xf32> -> vector<1x8x8xf32>
    "tpu.trace_stop"() : () -> ()
    %cst_18 = arith.constant 0.353553385 : f32
    %54 = vector.broadcast %cst_18 : f32 to vector<1x8x8xf32>
    %55 = arith.mulf %53, %54 : vector<1x8x8xf32>
    %cst_19 = arith.constant dense<0xFF800000> : vector<1x8xf32>
    %56 = vector.multi_reduction <maximumf>, %55, %cst_19 [2] : vector<1x8x8xf32> to vector<1x8xf32>
    %57 = vector.shape_cast %56 : vector<1x8xf32> to vector<1x8x1xf32>
    %58 = vector.broadcast %57 : vector<1x8x1xf32> to vector<1x8x8xf32>
    %59 = arith.subf %55, %58 : vector<1x8x8xf32>
    %60 = math.exp %59 : vector<1x8x8xf32>
    %cst_20 = arith.constant dense<0.000000e+00> : vector<1x8xf32>
    %61 = vector.multi_reduction <add>, %60, %cst_20 [2] : vector<1x8x8xf32> to vector<1x8xf32>
    %62 = vector.shape_cast %61 : vector<1x8xf32> to vector<1x8x1xf32>
    %63 = tpu.reciprocal %62 {approx = true} : vector<1x8x1xf32> -> vector<1x8x1xf32>
    %64 = vector.broadcast %63 : vector<1x8x1xf32> to vector<1x8x8xf32>
    %65 = arith.mulf %60, %64 : vector<1x8x8xf32>
    %66 = arith.truncf %65 : vector<1x8x8xf32> to vector<1x8x8xbf16>
    %67 = vector.extract_strided_slice %32 {offsets = [0, 0, 8], sizes = [1, 8, 8], strides = [1, 1, 1]} : vector<1x8x32xbf16> to vector<1x8x8xbf16>
    "tpu.trace_start"() <{level = 10 : i32, message = "bqk,bkd->bqd"}> : () -> ()
    %cst_21 = arith.constant dense<0.000000e+00> : vector<1x8x8xf32>
    %68 = tpu.matmul %66, %67, %cst_21 {dimension_numbers = #tpu.dot_dimension_numbers<[2], [1], [1], [2], [0, 0, 0, 1, 1, 2], [0], [0]>} : vector<1x8x8xbf16>, vector<1x8x8xbf16>, vector<1x8x8xf32> -> vector<1x8x8xf32>
    "tpu.trace_stop"() : () -> ()
    %69 = vector.extract_strided_slice %28 {offsets = [0, 0, 16], sizes = [1, 8, 8], strides = [1, 1, 1]} : vector<1x8x32xbf16> to vector<1x8x8xbf16>
    %70 = vector.extract_strided_slice %30 {offsets = [0, 0, 16], sizes = [1, 8, 8], strides = [1, 1, 1]} : vector<1x8x32xbf16> to vector<1x8x8xbf16>
    "tpu.trace_start"() <{level = 10 : i32, message = "bqd,bkd->bqk"}> : () -> ()
    %cst_22 = arith.constant dense<0.000000e+00> : vector<1x8x8xf32>
    %71 = tpu.matmul %69, %70, %cst_22 {dimension_numbers = #tpu.dot_dimension_numbers<[2], [2], [1], [1], [0, 0, 0, 1, 1, 1], [0], [0]>} : vector<1x8x8xbf16>, vector<1x8x8xbf16>, vector<1x8x8xf32> -> vector<1x8x8xf32>
    "tpu.trace_stop"() : () -> ()
    %cst_23 = arith.constant 0.353553385 : f32
    %72 = vector.broadcast %cst_23 : f32 to vector<1x8x8xf32>
    %73 = arith.mulf %71, %72 : vector<1x8x8xf32>
    %cst_24 = arith.constant dense<0xFF800000> : vector<1x8xf32>
    %74 = vector.multi_reduction <maximumf>, %73, %cst_24 [2] : vector<1x8x8xf32> to vector<1x8xf32>
    %75 = vector.shape_cast %74 : vector<1x8xf32> to vector<1x8x1xf32>
    %76 = vector.broadcast %75 : vector<1x8x1xf32> to vector<1x8x8xf32>
    %77 = arith.subf %73, %76 : vector<1x8x8xf32>
    %78 = math.exp %77 : vector<1x8x8xf32>
    %cst_25 = arith.constant dense<0.000000e+00> : vector<1x8xf32>
    %79 = vector.multi_reduction <add>, %78, %cst_25 [2] : vector<1x8x8xf32> to vector<1x8xf32>
    %80 = vector.shape_cast %79 : vector<1x8xf32> to vector<1x8x1xf32>
    %81 = tpu.reciprocal %80 {approx = true} : vector<1x8x1xf32> -> vector<1x8x1xf32>
    %82 = vector.broadcast %81 : vector<1x8x1xf32> to vector<1x8x8xf32>
    %83 = arith.mulf %78, %82 : vector<1x8x8xf32>
    %84 = arith.truncf %83 : vector<1x8x8xf32> to vector<1x8x8xbf16>
    %85 = vector.extract_strided_slice %32 {offsets = [0, 0, 16], sizes = [1, 8, 8], strides = [1, 1, 1]} : vector<1x8x32xbf16> to vector<1x8x8xbf16>
    "tpu.trace_start"() <{level = 10 : i32, message = "bqk,bkd->bqd"}> : () -> ()
    %cst_26 = arith.constant dense<0.000000e+00> : vector<1x8x8xf32>
    %86 = tpu.matmul %84, %85, %cst_26 {dimension_numbers = #tpu.dot_dimension_numbers<[2], [1], [1], [2], [0, 0, 0, 1, 1, 2], [0], [0]>} : vector<1x8x8xbf16>, vector<1x8x8xbf16>, vector<1x8x8xf32> -> vector<1x8x8xf32>
    "tpu.trace_stop"() : () -> ()
    %87 = vector.extract_strided_slice %28 {offsets = [0, 0, 24], sizes = [1, 8, 8], strides = [1, 1, 1]} : vector<1x8x32xbf16> to vector<1x8x8xbf16>
    %88 = vector.extract_strided_slice %30 {offsets = [0, 0, 24], sizes = [1, 8, 8], strides = [1, 1, 1]} : vector<1x8x32xbf16> to vector<1x8x8xbf16>
    "tpu.trace_start"() <{level = 10 : i32, message = "bqd,bkd->bqk"}> : () -> ()
    %cst_27 = arith.constant dense<0.000000e+00> : vector<1x8x8xf32>
    %89 = tpu.matmul %87, %88, %cst_27 {dimension_numbers = #tpu.dot_dimension_numbers<[2], [2], [1], [1], [0, 0, 0, 1, 1, 1], [0], [0]>} : vector<1x8x8xbf16>, vector<1x8x8xbf16>, vector<1x8x8xf32> -> vector<1x8x8xf32>
    "tpu.trace_stop"() : () -> ()
    %cst_28 = arith.constant 0.353553385 : f32
    %90 = vector.broadcast %cst_28 : f32 to vector<1x8x8xf32>
    %91 = arith.mulf %89, %90 : vector<1x8x8xf32>
    %cst_29 = arith.constant dense<0xFF800000> : vector<1x8xf32>
    %92 = vector.multi_reduction <maximumf>, %91, %cst_29 [2] : vector<1x8x8xf32> to vector<1x8xf32>
    %93 = vector.shape_cast %92 : vector<1x8xf32> to vector<1x8x1xf32>
    %94 = vector.broadcast %93 : vector<1x8x1xf32> to vector<1x8x8xf32>
    %95 = arith.subf %91, %94 : vector<1x8x8xf32>
    %96 = math.exp %95 : vector<1x8x8xf32>
    %cst_30 = arith.constant dense<0.000000e+00> : vector<1x8xf32>
    %97 = vector.multi_reduction <add>, %96, %cst_30 [2] : vector<1x8x8xf32> to vector<1x8xf32>
    %98 = vector.shape_cast %97 : vector<1x8xf32> to vector<1x8x1xf32>
    %99 = tpu.reciprocal %98 {approx = true} : vector<1x8x1xf32> -> vector<1x8x1xf32>
    %100 = vector.broadcast %99 : vector<1x8x1xf32> to vector<1x8x8xf32>
    %101 = arith.mulf %96, %100 : vector<1x8x8xf32>
    %102 = arith.truncf %101 : vector<1x8x8xf32> to vector<1x8x8xbf16>
    %103 = vector.extract_strided_slice %32 {offsets = [0, 0, 24], sizes = [1, 8, 8], strides = [1, 1, 1]} : vector<1x8x32xbf16> to vector<1x8x8xbf16>
    "tpu.trace_start"() <{level = 10 : i32, message = "bqk,bkd->bqd"}> : () -> ()
    %cst_31 = arith.constant dense<0.000000e+00> : vector<1x8x8xf32>
    %104 = tpu.matmul %102, %103, %cst_31 {dimension_numbers = #tpu.dot_dimension_numbers<[2], [1], [1], [2], [0, 0, 0, 1, 1, 2], [0], [0]>} : vector<1x8x8xbf16>, vector<1x8x8xbf16>, vector<1x8x8xf32> -> vector<1x8x8xf32>
    "tpu.trace_stop"() : () -> ()
    %105 = tpu.concatenate %50, %68, %86, %104 in 2 : vector<1x8x8xf32>, vector<1x8x8xf32>, vector<1x8x8xf32>, vector<1x8x8xf32> -> vector<1x8x32xf32>
    %106 = vector.shape_cast %105 : vector<1x8x32xf32> to vector<8x32xf32>
    %107 = arith.truncf %106 : vector<8x32xf32> to vector<8x32xbf16>
    %108 = vector.extract_strided_slice %4 {offsets = [96, 0], sizes = [32, 32], strides = [1, 1]} : vector<352x64xbf16> to vector<32x32xbf16>
    %cst_32 = arith.constant dense<0.000000e+00> : vector<8x32xf32>
    %109 = tpu.matmul %107, %108, %cst_32 {dimension_numbers = #tpu.dot_dimension_numbers<[1], [0], [0], [1], [0, 0, 1, 1], [], []>} : vector<8x32xbf16>, vector<32x32xbf16>, vector<8x32xf32> -> vector<8x32xf32>
    %110 = vector.extract_strided_slice %6 {offsets = [3, 0], sizes = [1, 32], strides = [1, 1]} : vector<16x64xf32> to vector<1x32xf32>
    %111 = vector.broadcast %110 : vector<1x32xf32> to vector<8x32xf32>
    %112 = arith.addf %109, %111 : vector<8x32xf32>
    %113 = arith.addf %7, %112 : vector<8x32xf32>
    %114 = vector.extract_strided_slice %6 {offsets = [10, 0], sizes = [1, 32], strides = [1, 1]} : vector<16x64xf32> to vector<1x32xf32>
    %115 = vector.extract_strided_slice %6 {offsets = [11, 0], sizes = [1, 32], strides = [1, 1]} : vector<16x64xf32> to vector<1x32xf32>
    %cst_33 = arith.constant dense<0.000000e+00> : vector<8xf32>
    %116 = vector.multi_reduction <add>, %113, %cst_33 [1] : vector<8x32xf32> to vector<8xf32>
    %117 = vector.shape_cast %116 : vector<8xf32> to vector<8x1xf32>
    %cst_34 = arith.constant 3.200000e+01 : f32
    %118 = vector.broadcast %cst_34 : f32 to vector<8x1xf32>
    %119 = arith.divf %117, %118 : vector<8x1xf32>
    %120 = arith.mulf %113, %113 : vector<8x32xf32>
    %cst_35 = arith.constant dense<0.000000e+00> : vector<8xf32>
    %121 = vector.multi_reduction <add>, %120, %cst_35 [1] : vector<8x32xf32> to vector<8xf32>
    %122 = vector.shape_cast %121 : vector<8xf32> to vector<8x1xf32>
    %cst_36 = arith.constant 3.200000e+01 : f32
    %123 = vector.broadcast %cst_36 : f32 to vector<8x1xf32>
    %124 = arith.divf %122, %123 : vector<8x1xf32>
    %125 = arith.mulf %119, %119 : vector<8x1xf32>
    %126 = arith.subf %124, %125 : vector<8x1xf32>
    %127 = vector.broadcast %119 : vector<8x1xf32> to vector<8x32xf32>
    %128 = arith.subf %113, %127 : vector<8x32xf32>
    %cst_37 = arith.constant 9.99999974E-6 : f32
    %129 = vector.broadcast %cst_37 : f32 to vector<8x1xf32>
    %130 = arith.addf %126, %129 : vector<8x1xf32>
    %131 = math.rsqrt %130 : vector<8x1xf32>
    %132 = vector.broadcast %131 : vector<8x1xf32> to vector<8x32xf32>
    %133 = arith.mulf %128, %132 : vector<8x32xf32>
    %134 = vector.broadcast %114 : vector<1x32xf32> to vector<8x32xf32>
    %135 = arith.mulf %133, %134 : vector<8x32xf32>
    %136 = vector.broadcast %115 : vector<1x32xf32> to vector<8x32xf32>
    %137 = arith.addf %135, %136 : vector<8x32xf32>
    %138 = arith.addf %137, %8 : vector<8x32xf32>
    %139 = arith.truncf %138 : vector<8x32xf32> to vector<8x32xbf16>
    %140 = vector.extract_strided_slice %4 {offsets = [128, 0], sizes = [32, 32], strides = [1, 1]} : vector<352x64xbf16> to vector<32x32xbf16>
    %cst_38 = arith.constant dense<0.000000e+00> : vector<8x32xf32>
    %141 = tpu.matmul %139, %140, %cst_38 {dimension_numbers = #tpu.dot_dimension_numbers<[1], [0], [0], [1], [0, 0, 1, 1], [], []>} : vector<8x32xbf16>, vector<32x32xbf16>, vector<8x32xf32> -> vector<8x32xf32>
    %142 = vector.extract_strided_slice %6 {offsets = [4, 0], sizes = [1, 32], strides = [1, 1]} : vector<16x64xf32> to vector<1x32xf32>
    %143 = vector.broadcast %142 : vector<1x32xf32> to vector<8x32xf32>
    %144 = arith.addf %141, %143 : vector<8x32xf32>
    %c0_39 = arith.constant 0 : index
    %c0_40 = arith.constant 0 : index
    %145 = vector.load %arg5[%c0_39, %c0_40] : memref<16x32xf32, #tpu.memory_space<vmem>>, vector<16x32xf32>
    %146 = arith.truncf %145 : vector<16x32xf32> to vector<16x32xbf16>
    %147 = vector.extract_strided_slice %4 {offsets = [160, 0], sizes = [32, 32], strides = [1, 1]} : vector<352x64xbf16> to vector<32x32xbf16>
    %cst_41 = arith.constant dense<0.000000e+00> : vector<16x32xf32>
    %148 = tpu.matmul %146, %147, %cst_41 {dimension_numbers = #tpu.dot_dimension_numbers<[1], [0], [0], [1], [0, 0, 1, 1], [], []>} : vector<16x32xbf16>, vector<32x32xbf16>, vector<16x32xf32> -> vector<16x32xf32>
    %149 = vector.extract_strided_slice %6 {offsets = [5, 0], sizes = [1, 32], strides = [1, 1]} : vector<16x64xf32> to vector<1x32xf32>
    %150 = vector.broadcast %149 : vector<1x32xf32> to vector<16x32xf32>
    %151 = arith.addf %148, %150 : vector<16x32xf32>
    %c0_42 = arith.constant 0 : index
    %c0_43 = arith.constant 0 : index
    %152 = vector.load %arg4[%c0_42, %c0_43] : memref<16x32xf32, #tpu.memory_space<vmem>>, vector<16x32xf32>
    %153 = arith.truncf %152 : vector<16x32xf32> to vector<16x32xbf16>
    %154 = vector.extract_strided_slice %4 {offsets = [192, 0], sizes = [32, 32], strides = [1, 1]} : vector<352x64xbf16> to vector<32x32xbf16>
    %cst_44 = arith.constant dense<0.000000e+00> : vector<16x32xf32>
    %155 = tpu.matmul %153, %154, %cst_44 {dimension_numbers = #tpu.dot_dimension_numbers<[1], [0], [0], [1], [0, 0, 1, 1], [], []>} : vector<16x32xbf16>, vector<32x32xbf16>, vector<16x32xf32> -> vector<16x32xf32>
    %156 = vector.extract_strided_slice %6 {offsets = [6, 0], sizes = [1, 32], strides = [1, 1]} : vector<16x64xf32> to vector<1x32xf32>
    %157 = vector.broadcast %156 : vector<1x32xf32> to vector<16x32xf32>
    %158 = arith.addf %155, %157 : vector<16x32xf32>
    %159 = arith.truncf %144 : vector<8x32xf32> to vector<8x32xbf16>
    %160 = vector.shape_cast %159 : vector<8x32xbf16> to vector<1x8x32xbf16>
    %161 = arith.truncf %151 : vector<16x32xf32> to vector<16x32xbf16>
    %162 = vector.shape_cast %161 : vector<16x32xbf16> to vector<1x16x32xbf16>
    %163 = arith.truncf %158 : vector<16x32xf32> to vector<16x32xbf16>
    %164 = vector.shape_cast %163 : vector<16x32xbf16> to vector<1x16x32xbf16>
    %165 = vector.extract_strided_slice %160 {offsets = [0, 0, 0], sizes = [1, 8, 8], strides = [1, 1, 1]} : vector<1x8x32xbf16> to vector<1x8x8xbf16>
    %166 = vector.extract_strided_slice %162 {offsets = [0, 0, 0], sizes = [1, 16, 8], strides = [1, 1, 1]} : vector<1x16x32xbf16> to vector<1x16x8xbf16>
    "tpu.trace_start"() <{level = 10 : i32, message = "bqd,bkd->bqk"}> : () -> ()
    %cst_45 = arith.constant dense<0.000000e+00> : vector<1x8x16xf32>
    %167 = tpu.matmul %165, %166, %cst_45 {dimension_numbers = #tpu.dot_dimension_numbers<[2], [2], [1], [1], [0, 0, 0, 1, 1, 1], [0], [0]>} : vector<1x8x8xbf16>, vector<1x16x8xbf16>, vector<1x8x16xf32> -> vector<1x8x16xf32>
    "tpu.trace_stop"() : () -> ()
    %cst_46 = arith.constant 0.353553385 : f32
    %168 = vector.broadcast %cst_46 : f32 to vector<1x8x16xf32>
    %169 = arith.mulf %167, %168 : vector<1x8x16xf32>
    %cst_47 = arith.constant dense<0xFF800000> : vector<1x8xf32>
    %170 = vector.multi_reduction <maximumf>, %169, %cst_47 [2] : vector<1x8x16xf32> to vector<1x8xf32>
    %171 = vector.shape_cast %170 : vector<1x8xf32> to vector<1x8x1xf32>
    %172 = vector.broadcast %171 : vector<1x8x1xf32> to vector<1x8x16xf32>
    %173 = arith.subf %169, %172 : vector<1x8x16xf32>
    %174 = math.exp %173 : vector<1x8x16xf32>
    %cst_48 = arith.constant dense<0.000000e+00> : vector<1x8xf32>
    %175 = vector.multi_reduction <add>, %174, %cst_48 [2] : vector<1x8x16xf32> to vector<1x8xf32>
    %176 = vector.shape_cast %175 : vector<1x8xf32> to vector<1x8x1xf32>
    %177 = tpu.reciprocal %176 {approx = true} : vector<1x8x1xf32> -> vector<1x8x1xf32>
    %178 = vector.broadcast %177 : vector<1x8x1xf32> to vector<1x8x16xf32>
    %179 = arith.mulf %174, %178 : vector<1x8x16xf32>
    %180 = arith.truncf %179 : vector<1x8x16xf32> to vector<1x8x16xbf16>
    %181 = vector.extract_strided_slice %164 {offsets = [0, 0, 0], sizes = [1, 16, 8], strides = [1, 1, 1]} : vector<1x16x32xbf16> to vector<1x16x8xbf16>
    "tpu.trace_start"() <{level = 10 : i32, message = "bqk,bkd->bqd"}> : () -> ()
    %cst_49 = arith.constant dense<0.000000e+00> : vector<1x8x8xf32>
    %182 = tpu.matmul %180, %181, %cst_49 {dimension_numbers = #tpu.dot_dimension_numbers<[2], [1], [1], [2], [0, 0, 0, 1, 1, 2], [0], [0]>} : vector<1x8x16xbf16>, vector<1x16x8xbf16>, vector<1x8x8xf32> -> vector<1x8x8xf32>
    "tpu.trace_stop"() : () -> ()
    %183 = vector.extract_strided_slice %160 {offsets = [0, 0, 8], sizes = [1, 8, 8], strides = [1, 1, 1]} : vector<1x8x32xbf16> to vector<1x8x8xbf16>
    %184 = vector.extract_strided_slice %162 {offsets = [0, 0, 8], sizes = [1, 16, 8], strides = [1, 1, 1]} : vector<1x16x32xbf16> to vector<1x16x8xbf16>
    "tpu.trace_start"() <{level = 10 : i32, message = "bqd,bkd->bqk"}> : () -> ()
    %cst_50 = arith.constant dense<0.000000e+00> : vector<1x8x16xf32>
    %185 = tpu.matmul %183, %184, %cst_50 {dimension_numbers = #tpu.dot_dimension_numbers<[2], [2], [1], [1], [0, 0, 0, 1, 1, 1], [0], [0]>} : vector<1x8x8xbf16>, vector<1x16x8xbf16>, vector<1x8x16xf32> -> vector<1x8x16xf32>
    "tpu.trace_stop"() : () -> ()
    %cst_51 = arith.constant 0.353553385 : f32
    %186 = vector.broadcast %cst_51 : f32 to vector<1x8x16xf32>
    %187 = arith.mulf %185, %186 : vector<1x8x16xf32>
    %cst_52 = arith.constant dense<0xFF800000> : vector<1x8xf32>
    %188 = vector.multi_reduction <maximumf>, %187, %cst_52 [2] : vector<1x8x16xf32> to vector<1x8xf32>
    %189 = vector.shape_cast %188 : vector<1x8xf32> to vector<1x8x1xf32>
    %190 = vector.broadcast %189 : vector<1x8x1xf32> to vector<1x8x16xf32>
    %191 = arith.subf %187, %190 : vector<1x8x16xf32>
    %192 = math.exp %191 : vector<1x8x16xf32>
    %cst_53 = arith.constant dense<0.000000e+00> : vector<1x8xf32>
    %193 = vector.multi_reduction <add>, %192, %cst_53 [2] : vector<1x8x16xf32> to vector<1x8xf32>
    %194 = vector.shape_cast %193 : vector<1x8xf32> to vector<1x8x1xf32>
    %195 = tpu.reciprocal %194 {approx = true} : vector<1x8x1xf32> -> vector<1x8x1xf32>
    %196 = vector.broadcast %195 : vector<1x8x1xf32> to vector<1x8x16xf32>
    %197 = arith.mulf %192, %196 : vector<1x8x16xf32>
    %198 = arith.truncf %197 : vector<1x8x16xf32> to vector<1x8x16xbf16>
    %199 = vector.extract_strided_slice %164 {offsets = [0, 0, 8], sizes = [1, 16, 8], strides = [1, 1, 1]} : vector<1x16x32xbf16> to vector<1x16x8xbf16>
    "tpu.trace_start"() <{level = 10 : i32, message = "bqk,bkd->bqd"}> : () -> ()
    %cst_54 = arith.constant dense<0.000000e+00> : vector<1x8x8xf32>
    %200 = tpu.matmul %198, %199, %cst_54 {dimension_numbers = #tpu.dot_dimension_numbers<[2], [1], [1], [2], [0, 0, 0, 1, 1, 2], [0], [0]>} : vector<1x8x16xbf16>, vector<1x16x8xbf16>, vector<1x8x8xf32> -> vector<1x8x8xf32>
    "tpu.trace_stop"() : () -> ()
    %201 = vector.extract_strided_slice %160 {offsets = [0, 0, 16], sizes = [1, 8, 8], strides = [1, 1, 1]} : vector<1x8x32xbf16> to vector<1x8x8xbf16>
    %202 = vector.extract_strided_slice %162 {offsets = [0, 0, 16], sizes = [1, 16, 8], strides = [1, 1, 1]} : vector<1x16x32xbf16> to vector<1x16x8xbf16>
    "tpu.trace_start"() <{level = 10 : i32, message = "bqd,bkd->bqk"}> : () -> ()
    %cst_55 = arith.constant dense<0.000000e+00> : vector<1x8x16xf32>
    %203 = tpu.matmul %201, %202, %cst_55 {dimension_numbers = #tpu.dot_dimension_numbers<[2], [2], [1], [1], [0, 0, 0, 1, 1, 1], [0], [0]>} : vector<1x8x8xbf16>, vector<1x16x8xbf16>, vector<1x8x16xf32> -> vector<1x8x16xf32>
    "tpu.trace_stop"() : () -> ()
    %cst_56 = arith.constant 0.353553385 : f32
    %204 = vector.broadcast %cst_56 : f32 to vector<1x8x16xf32>
    %205 = arith.mulf %203, %204 : vector<1x8x16xf32>
    %cst_57 = arith.constant dense<0xFF800000> : vector<1x8xf32>
    %206 = vector.multi_reduction <maximumf>, %205, %cst_57 [2] : vector<1x8x16xf32> to vector<1x8xf32>
    %207 = vector.shape_cast %206 : vector<1x8xf32> to vector<1x8x1xf32>
    %208 = vector.broadcast %207 : vector<1x8x1xf32> to vector<1x8x16xf32>
    %209 = arith.subf %205, %208 : vector<1x8x16xf32>
    %210 = math.exp %209 : vector<1x8x16xf32>
    %cst_58 = arith.constant dense<0.000000e+00> : vector<1x8xf32>
    %211 = vector.multi_reduction <add>, %210, %cst_58 [2] : vector<1x8x16xf32> to vector<1x8xf32>
    %212 = vector.shape_cast %211 : vector<1x8xf32> to vector<1x8x1xf32>
    %213 = tpu.reciprocal %212 {approx = true} : vector<1x8x1xf32> -> vector<1x8x1xf32>
    %214 = vector.broadcast %213 : vector<1x8x1xf32> to vector<1x8x16xf32>
    %215 = arith.mulf %210, %214 : vector<1x8x16xf32>
    %216 = arith.truncf %215 : vector<1x8x16xf32> to vector<1x8x16xbf16>
    %217 = vector.extract_strided_slice %164 {offsets = [0, 0, 16], sizes = [1, 16, 8], strides = [1, 1, 1]} : vector<1x16x32xbf16> to vector<1x16x8xbf16>
    "tpu.trace_start"() <{level = 10 : i32, message = "bqk,bkd->bqd"}> : () -> ()
    %cst_59 = arith.constant dense<0.000000e+00> : vector<1x8x8xf32>
    %218 = tpu.matmul %216, %217, %cst_59 {dimension_numbers = #tpu.dot_dimension_numbers<[2], [1], [1], [2], [0, 0, 0, 1, 1, 2], [0], [0]>} : vector<1x8x16xbf16>, vector<1x16x8xbf16>, vector<1x8x8xf32> -> vector<1x8x8xf32>
    "tpu.trace_stop"() : () -> ()
    %219 = vector.extract_strided_slice %160 {offsets = [0, 0, 24], sizes = [1, 8, 8], strides = [1, 1, 1]} : vector<1x8x32xbf16> to vector<1x8x8xbf16>
    %220 = vector.extract_strided_slice %162 {offsets = [0, 0, 24], sizes = [1, 16, 8], strides = [1, 1, 1]} : vector<1x16x32xbf16> to vector<1x16x8xbf16>
    "tpu.trace_start"() <{level = 10 : i32, message = "bqd,bkd->bqk"}> : () -> ()
    %cst_60 = arith.constant dense<0.000000e+00> : vector<1x8x16xf32>
    %221 = tpu.matmul %219, %220, %cst_60 {dimension_numbers = #tpu.dot_dimension_numbers<[2], [2], [1], [1], [0, 0, 0, 1, 1, 1], [0], [0]>} : vector<1x8x8xbf16>, vector<1x16x8xbf16>, vector<1x8x16xf32> -> vector<1x8x16xf32>
    "tpu.trace_stop"() : () -> ()
    %cst_61 = arith.constant 0.353553385 : f32
    %222 = vector.broadcast %cst_61 : f32 to vector<1x8x16xf32>
    %223 = arith.mulf %221, %222 : vector<1x8x16xf32>
    %cst_62 = arith.constant dense<0xFF800000> : vector<1x8xf32>
    %224 = vector.multi_reduction <maximumf>, %223, %cst_62 [2] : vector<1x8x16xf32> to vector<1x8xf32>
    %225 = vector.shape_cast %224 : vector<1x8xf32> to vector<1x8x1xf32>
    %226 = vector.broadcast %225 : vector<1x8x1xf32> to vector<1x8x16xf32>
    %227 = arith.subf %223, %226 : vector<1x8x16xf32>
    %228 = math.exp %227 : vector<1x8x16xf32>
    %cst_63 = arith.constant dense<0.000000e+00> : vector<1x8xf32>
    %229 = vector.multi_reduction <add>, %228, %cst_63 [2] : vector<1x8x16xf32> to vector<1x8xf32>
    %230 = vector.shape_cast %229 : vector<1x8xf32> to vector<1x8x1xf32>
    %231 = tpu.reciprocal %230 {approx = true} : vector<1x8x1xf32> -> vector<1x8x1xf32>
    %232 = vector.broadcast %231 : vector<1x8x1xf32> to vector<1x8x16xf32>
    %233 = arith.mulf %228, %232 : vector<1x8x16xf32>
    %234 = arith.truncf %233 : vector<1x8x16xf32> to vector<1x8x16xbf16>
    %235 = vector.extract_strided_slice %164 {offsets = [0, 0, 24], sizes = [1, 16, 8], strides = [1, 1, 1]} : vector<1x16x32xbf16> to vector<1x16x8xbf16>
    "tpu.trace_start"() <{level = 10 : i32, message = "bqk,bkd->bqd"}> : () -> ()
    %cst_64 = arith.constant dense<0.000000e+00> : vector<1x8x8xf32>
    %236 = tpu.matmul %234, %235, %cst_64 {dimension_numbers = #tpu.dot_dimension_numbers<[2], [1], [1], [2], [0, 0, 0, 1, 1, 2], [0], [0]>} : vector<1x8x16xbf16>, vector<1x16x8xbf16>, vector<1x8x8xf32> -> vector<1x8x8xf32>
    "tpu.trace_stop"() : () -> ()
    %237 = tpu.concatenate %182, %200, %218, %236 in 2 : vector<1x8x8xf32>, vector<1x8x8xf32>, vector<1x8x8xf32>, vector<1x8x8xf32> -> vector<1x8x32xf32>
    %238 = vector.shape_cast %237 : vector<1x8x32xf32> to vector<8x32xf32>
    %239 = arith.truncf %238 : vector<8x32xf32> to vector<8x32xbf16>
    %240 = vector.extract_strided_slice %4 {offsets = [224, 0], sizes = [32, 32], strides = [1, 1]} : vector<352x64xbf16> to vector<32x32xbf16>
    %cst_65 = arith.constant dense<0.000000e+00> : vector<8x32xf32>
    %241 = tpu.matmul %239, %240, %cst_65 {dimension_numbers = #tpu.dot_dimension_numbers<[1], [0], [0], [1], [0, 0, 1, 1], [], []>} : vector<8x32xbf16>, vector<32x32xbf16>, vector<8x32xf32> -> vector<8x32xf32>
    %242 = vector.extract_strided_slice %6 {offsets = [7, 0], sizes = [1, 32], strides = [1, 1]} : vector<16x64xf32> to vector<1x32xf32>
    %243 = vector.broadcast %242 : vector<1x32xf32> to vector<8x32xf32>
    %244 = arith.addf %241, %243 : vector<8x32xf32>
    %245 = arith.addf %137, %244 : vector<8x32xf32>
    %246 = vector.extract_strided_slice %6 {offsets = [12, 0], sizes = [1, 32], strides = [1, 1]} : vector<16x64xf32> to vector<1x32xf32>
    %247 = vector.extract_strided_slice %6 {offsets = [13, 0], sizes = [1, 32], strides = [1, 1]} : vector<16x64xf32> to vector<1x32xf32>
    %cst_66 = arith.constant dense<0.000000e+00> : vector<8xf32>
    %248 = vector.multi_reduction <add>, %245, %cst_66 [1] : vector<8x32xf32> to vector<8xf32>
    %249 = vector.shape_cast %248 : vector<8xf32> to vector<8x1xf32>
    %cst_67 = arith.constant 3.200000e+01 : f32
    %250 = vector.broadcast %cst_67 : f32 to vector<8x1xf32>
    %251 = arith.divf %249, %250 : vector<8x1xf32>
    %252 = arith.mulf %245, %245 : vector<8x32xf32>
    %cst_68 = arith.constant dense<0.000000e+00> : vector<8xf32>
    %253 = vector.multi_reduction <add>, %252, %cst_68 [1] : vector<8x32xf32> to vector<8xf32>
    %254 = vector.shape_cast %253 : vector<8xf32> to vector<8x1xf32>
    %cst_69 = arith.constant 3.200000e+01 : f32
    %255 = vector.broadcast %cst_69 : f32 to vector<8x1xf32>
    %256 = arith.divf %254, %255 : vector<8x1xf32>
    %257 = arith.mulf %251, %251 : vector<8x1xf32>
    %258 = arith.subf %256, %257 : vector<8x1xf32>
    %259 = vector.broadcast %251 : vector<8x1xf32> to vector<8x32xf32>
    %260 = arith.subf %245, %259 : vector<8x32xf32>
    %cst_70 = arith.constant 9.99999974E-6 : f32
    %261 = vector.broadcast %cst_70 : f32 to vector<8x1xf32>
    %262 = arith.addf %258, %261 : vector<8x1xf32>
    %263 = math.rsqrt %262 : vector<8x1xf32>
    %264 = vector.broadcast %263 : vector<8x1xf32> to vector<8x32xf32>
    %265 = arith.mulf %260, %264 : vector<8x32xf32>
    %266 = vector.broadcast %246 : vector<1x32xf32> to vector<8x32xf32>
    %267 = arith.mulf %265, %266 : vector<8x32xf32>
    %268 = vector.broadcast %247 : vector<1x32xf32> to vector<8x32xf32>
    %269 = arith.addf %267, %268 : vector<8x32xf32>
    %270 = arith.truncf %269 : vector<8x32xf32> to vector<8x32xbf16>
    %271 = vector.extract_strided_slice %4 {offsets = [256, 0], sizes = [32, 64], strides = [1, 1]} : vector<352x64xbf16> to vector<32x64xbf16>
    %cst_71 = arith.constant dense<0.000000e+00> : vector<8x64xf32>
    %272 = tpu.matmul %270, %271, %cst_71 {dimension_numbers = #tpu.dot_dimension_numbers<[1], [0], [0], [1], [0, 0, 1, 1], [], []>} : vector<8x32xbf16>, vector<32x64xbf16>, vector<8x64xf32> -> vector<8x64xf32>
    %273 = vector.extract_strided_slice %6 {offsets = [8, 0], sizes = [1, 64], strides = [1, 1]} : vector<16x64xf32> to vector<1x64xf32>
    %274 = vector.broadcast %273 : vector<1x64xf32> to vector<8x64xf32>
    %275 = arith.addf %272, %274 : vector<8x64xf32>
    %cst_72 = arith.constant 0.000000e+00 : f32
    %276 = vector.broadcast %cst_72 : f32 to vector<8x64xf32>
    %277 = arith.maximumf %275, %276 : vector<8x64xf32>
    %278 = arith.truncf %277 : vector<8x64xf32> to vector<8x64xbf16>
    %279 = vector.extract_strided_slice %4 {offsets = [288, 0], sizes = [64, 32], strides = [1, 1]} : vector<352x64xbf16> to vector<64x32xbf16>
    %cst_73 = arith.constant dense<0.000000e+00> : vector<8x32xf32>
    %280 = tpu.matmul %278, %279, %cst_73 {dimension_numbers = #tpu.dot_dimension_numbers<[1], [0], [0], [1], [0, 0, 1, 1], [], []>} : vector<8x64xbf16>, vector<64x32xbf16>, vector<8x32xf32> -> vector<8x32xf32>
    %281 = vector.extract_strided_slice %6 {offsets = [9, 0], sizes = [1, 32], strides = [1, 1]} : vector<16x64xf32> to vector<1x32xf32>
    %282 = vector.broadcast %281 : vector<1x32xf32> to vector<8x32xf32>
    %283 = arith.addf %280, %282 : vector<8x32xf32>
    %284 = arith.addf %269, %283 : vector<8x32xf32>
    %285 = vector.extract_strided_slice %6 {offsets = [14, 0], sizes = [1, 32], strides = [1, 1]} : vector<16x64xf32> to vector<1x32xf32>
    %286 = vector.extract_strided_slice %6 {offsets = [15, 0], sizes = [1, 32], strides = [1, 1]} : vector<16x64xf32> to vector<1x32xf32>
    %cst_74 = arith.constant dense<0.000000e+00> : vector<8xf32>
    %287 = vector.multi_reduction <add>, %284, %cst_74 [1] : vector<8x32xf32> to vector<8xf32>
    %288 = vector.shape_cast %287 : vector<8xf32> to vector<8x1xf32>
    %cst_75 = arith.constant 3.200000e+01 : f32
    %289 = vector.broadcast %cst_75 : f32 to vector<8x1xf32>
    %290 = arith.divf %288, %289 : vector<8x1xf32>
    %291 = arith.mulf %284, %284 : vector<8x32xf32>
    %cst_76 = arith.constant dense<0.000000e+00> : vector<8xf32>
    %292 = vector.multi_reduction <add>, %291, %cst_76 [1] : vector<8x32xf32> to vector<8xf32>
    %293 = vector.shape_cast %292 : vector<8xf32> to vector<8x1xf32>
    %cst_77 = arith.constant 3.200000e+01 : f32
    %294 = vector.broadcast %cst_77 : f32 to vector<8x1xf32>
    %295 = arith.divf %293, %294 : vector<8x1xf32>
    %296 = arith.mulf %290, %290 : vector<8x1xf32>
    %297 = arith.subf %295, %296 : vector<8x1xf32>
    %298 = vector.broadcast %290 : vector<8x1xf32> to vector<8x32xf32>
    %299 = arith.subf %284, %298 : vector<8x32xf32>
    %cst_78 = arith.constant 9.99999974E-6 : f32
    %300 = vector.broadcast %cst_78 : f32 to vector<8x1xf32>
    %301 = arith.addf %297, %300 : vector<8x1xf32>
    %302 = math.rsqrt %301 : vector<8x1xf32>
    %303 = vector.broadcast %302 : vector<8x1xf32> to vector<8x32xf32>
    %304 = arith.mulf %299, %303 : vector<8x32xf32>
    %305 = vector.broadcast %285 : vector<1x32xf32> to vector<8x32xf32>
    %306 = arith.mulf %304, %305 : vector<8x32xf32>
    %307 = vector.broadcast %286 : vector<1x32xf32> to vector<8x32xf32>
    %308 = arith.addf %306, %307 : vector<8x32xf32>
    %c0_79 = arith.constant 0 : index
    %c0_80 = arith.constant 0 : index
    %309 = vector.load %arg10[%c0_79, %c0_80] : memref<8x32xf32, #tpu.memory_space<vmem>>, vector<8x32xf32>
    tpu.vector_store %arg10[%c0_79, %c0_80], %308 {strides = array<i32>} : memref<8x32xf32, #tpu.memory_space<vmem>>, vector<8x32xf32>,
    %c1_i32 = arith.constant 1 : i32
    %310 = arith.cmpi eq, %arg1, %c1_i32 : i32
    %311 = arith.extui %310 : i1 to i32
    %c0_i32_81 = arith.constant 0 : i32
    %312 = arith.cmpi ne, %311, %c0_i32_81 : i32
    scf.if %312 {
      %c0_82 = arith.constant 0 : index
      %c0_83 = arith.constant 0 : index
      %313 = vector.load %arg8[%c0_82, %c0_83] : memref<2x32xf32, #tpu.memory_space<vmem>>, vector<1x32xf32>
      %c1 = arith.constant 1 : index
      %c0_84 = arith.constant 0 : index
      %314 = vector.load %arg8[%c1, %c0_84] : memref<2x32xf32, #tpu.memory_space<vmem>>, vector<1x32xf32>
      %cst_85 = arith.constant dense<0.000000e+00> : vector<8xf32>
      %315 = vector.multi_reduction <add>, %308, %cst_85 [1] : vector<8x32xf32> to vector<8xf32>
      %316 = vector.shape_cast %315 : vector<8xf32> to vector<8x1xf32>
      %cst_86 = arith.constant 3.200000e+01 : f32
      %317 = vector.broadcast %cst_86 : f32 to vector<8x1xf32>
      %318 = arith.divf %316, %317 : vector<8x1xf32>
      %319 = arith.mulf %308, %308 : vector<8x32xf32>
      %cst_87 = arith.constant dense<0.000000e+00> : vector<8xf32>
      %320 = vector.multi_reduction <add>, %319, %cst_87 [1] : vector<8x32xf32> to vector<8xf32>
      %321 = vector.shape_cast %320 : vector<8xf32> to vector<8x1xf32>
      %cst_88 = arith.constant 3.200000e+01 : f32
      %322 = vector.broadcast %cst_88 : f32 to vector<8x1xf32>
      %323 = arith.divf %321, %322 : vector<8x1xf32>
      %324 = arith.mulf %318, %318 : vector<8x1xf32>
      %325 = arith.subf %323, %324 : vector<8x1xf32>
      %326 = vector.broadcast %318 : vector<8x1xf32> to vector<8x32xf32>
      %327 = arith.subf %308, %326 : vector<8x32xf32>
      %cst_89 = arith.constant 9.99999974E-6 : f32
      %328 = vector.broadcast %cst_89 : f32 to vector<8x1xf32>
      %329 = arith.addf %325, %328 : vector<8x1xf32>
      %330 = math.rsqrt %329 : vector<8x1xf32>
      %331 = vector.broadcast %330 : vector<8x1xf32> to vector<8x32xf32>
      %332 = arith.mulf %327, %331 : vector<8x32xf32>
      %333 = vector.broadcast %313 : vector<1x32xf32> to vector<8x32xf32>
      %334 = arith.mulf %332, %333 : vector<8x32xf32>
      %335 = vector.broadcast %314 : vector<1x32xf32> to vector<8x32xf32>
      %336 = arith.addf %334, %335 : vector<8x32xf32>
      %c0_90 = arith.constant 0 : index
      %c0_91 = arith.constant 0 : index
      %337 = vector.load %arg9[%c0_90, %c0_91] : memref<8x32xf32, #tpu.memory_space<vmem>>, vector<8x32xf32>
      tpu.vector_store %arg9[%c0_90, %c0_91], %336 {strides = array<i32>} : memref<8x32xf32, #tpu.memory_space<vmem>>, vector<8x32xf32>,
    } else {
    }
    return
  }
  func.func @transform_0(%arg0: i32, %arg1: i32) -> (i32, i32) {
    %c0_i32 = arith.constant 0 : i32
    %c0_i32_0 = arith.constant 0 : i32
    return %arg0, %c0_i32 : i32, i32
  }
  func.func @transform_1(%arg0: i32, %arg1: i32) -> (i32, i32) {
    %c0_i32 = arith.constant 0 : i32
    %c0_i32_0 = arith.constant 0 : i32
    return %arg0, %c0_i32 : i32, i32
  }
  func.func @transform_2(%arg0: i32, %arg1: i32) -> (i32, i32) {
    %c0_i32 = arith.constant 0 : i32
    %c0_i32_0 = arith.constant 0 : i32
    return %arg0, %c0_i32 : i32, i32
  }
  func.func @transform_3(%arg0: i32, %arg1: i32) -> (i32, i32) {
    %c0_i32 = arith.constant 0 : i32
    %c0_i32_0 = arith.constant 0 : i32
    return %arg0, %c0_i32 : i32, i32
  }
  func.func @transform_4(%arg0: i32, %arg1: i32) -> (i32, i32, i32) {
    %c0_i32 = arith.constant 0 : i32
    %c0_i32_0 = arith.constant 0 : i32
    %c0_i32_1 = arith.constant 0 : i32
    return %arg1, %c0_i32, %c0_i32_0 : i32, i32, i32
  }
  func.func @transform_5(%arg0: i32, %arg1: i32) -> (i32, i32, i32) {
    %c0_i32 = arith.constant 0 : i32
    %c0_i32_0 = arith.constant 0 : i32
    %c0_i32_1 = arith.constant 0 : i32
    return %arg1, %c0_i32, %c0_i32_0 : i32, i32, i32
  }
  func.func @transform_6(%arg0: i32, %arg1: i32) -> (i32, i32) {
    %c0_i32 = arith.constant 0 : i32
    %c0_i32_0 = arith.constant 0 : i32
    %c0_i32_1 = arith.constant 0 : i32
    return %c0_i32, %c0_i32_0 : i32, i32
  }
  func.func @transform_7(%arg0: i32, %arg1: i32) -> (i32, i32) {
    %c0_i32 = arith.constant 0 : i32
    %c0_i32_0 = arith.constant 0 : i32
    return %arg0, %c0_i32 : i32, i32
  }
}

</mosaic_0001>

<bundles_post_ra>
// kernel: tpu_custom_call.1
= control target key start
LH: loop header
LB: loop body
LE: loop exit
PB: predicated region body
PF: predicated region fallthrough
CT: control target
= control target key end

     0   :  { %s3279_s0 = inlined_call_operand.vmem [shape: f32[16,32], index: 0, kind: input, shape index: {}]   ;;  %s3280_s1 = inlined_call_operand.vmem [shape: f32[16,32], index: 1, kind: input, shape index: {}]   ;;  %s3281_s2 = inlined_call_operand.vmem [shape: f32[32,32], index: 2, kind: input, shape index: {}]   ;;  %s3282_s3 = inlined_call_operand.vmem [shape: f32[32,32], index: 3, kind: input, shape index: {}]   ;;  %s3283_s4 = inlined_call_operand.vmem [shape: bf16[2,352,64], index: 4, kind: input, shape index: {}]   ;;  %s3284_s5 = inlined_call_operand.vmem [shape: f32[2,16,64], index: 5, kind: input, shape index: {}]   ;;  %s3285_s6 = inlined_call_operand.vmem [shape: f32[2,32], index: 6, kind: input, shape index: {}]   ;;  %s3286_s7 = inlined_call_operand.hbm [shape: f32[16,32], index: 7, kind: output, shape index: {}]  }
   0x1   :  { %3296 = sst [smem:[#allocation15_spill]] %s3279_s0 }
   0x2   :  { %12 = vsyncpa [#allocation4], 0 }
   0x3   :  { %14 = vsyncpa [#allocation4 + $0x1], 0  ;;  %s2832_s24 = smov 0   ;;  %s2834_s25 = smov 0  }
   0x4   :  { %s2836_s26 = smov 0   ;;  %s2838_s27 = smov 0  }
   0x5   :  { %s2840_s28 = smov 0   ;;  %s2842_s29 = smov 0  }
   0x6   :  { %s2844_s30 = smov 0   ;;  %s2846_s8 = smov 0  }
   0x7 LB: > { %3297 = sst [smem:[#allocation6_spill]] %s2753_s24  ;;  %s2231_s9 = sadd.s32 4294967295, %s2781_s8   ;;  %s2781_s8 = sphi %s2846_s8, %s20_s8   ;;  %s2777_s30 = sphi %s2844_s30, %s3318_s30   ;;  %s2773_s29 = sphi %s2842_s29, %s3317_s29   ;;  %s2769_s28 = sphi %s2840_s28, %s3316_s28   ;;  %s2765_s27 = sphi %s2838_s27, %s3315_s27   ;;  %s2761_s26 = sphi %s2836_s26, %s3314_s26   ;;  %s2757_s25 = sphi %s2834_s25, %s3320_s25   ;;  %s2753_s24 = sphi %s2832_s24, %s3319_s24  }
   0x8   : > { %3298 = sst [smem:[#allocation7_spill]] %s2761_s26  ;;  %s2232_s10 = sadd.s32 4294967294, %s2781_s8  }
   0x9   : > { %3299 = sst [smem:[#allocation8_spill]] %s2773_s29  ;;  %s29_s11 = sadd.s32 1, %s2773_s29 }
   0xa   : > { %3300 = sst [smem:[#allocation9_spill]] %s2777_s30  ;;  %p30_p0 = scmp.ge.s32.totalorder %s29_s11, 2 }
   0xb   : > { %3301 = sst [smem:[#allocation10_spill]] %s2781_s8  ;;  %s32_s12 = sadd.s32 1, %s2777_s30 }
   0xc   : > { %p226_p1 = scmp.ne.s32.totalorder %s2761_s26, %s2757_s25  ;;  %p227_p2 = scmp.eq.s32.totalorder %s2231_s9, 3 }
   0xd   : > { %s3322_s11 = smov (%p30_p0, %s29_s11), 0  ;;  %s3324_s12 = smov (!%p30_p0, %s32_s12), %s2777_s30 }
   0xe   : > { %3302 = sst [smem:[#allocation11_spill]] %s3322_s11  ;;  %p2881_p3 = por %p227_p2, %p226_p1 }
   0xf   : > { %p232_p4 = scmp.ne.s32.totalorder %s2757_s25, %s2753_s24  ;;  %p34_p5 = scmp.ge.s32.totalorder %s3324_s12, 2 }
  0x10   : > { %p233_p6 = scmp.eq.s32.totalorder %s2232_s10, 3  ;;  %p2235_p7 = scmp.ge.s32.totalorder %s2781_s8, 1 }
  0x11   : > { %p302_p8 = scmp.lt.s32.totalorder %s2781_s8, 5  ;;  %s3326_s12 = smov (%p34_p5, %s3324_s12), 0 }
  0x12   : > { %3304 = sst [smem:[#allocation12_spill]] %s3326_s12  ;;  %p2891_p9 = por %p233_p6, %p232_p4 }
  0x13   : > { %p303_p10 = pnand %p2235_p7, %p302_p8  ;;  %s213_s15 = ssub.s32 %s2777_s30, %s3326_s12 }
  0x14   : > { %s3305_s14 = scalar_select %p2891_p9, 1, 0 }
  0x15   : > { %s216_s16 = sadd.s32 1, %s2761_s26  ;;  %p214_p11 = scmp.eq.s32.totalorder %s213_s15, 0 }
  0x16   : > { %3306 = sst [smem:[#allocation13_spill]] %s3305_s14  ;;  %306 = sbr.rel (%p303_p10) target bundleno = 3851 (0xf0b), region = 48 }
  0x17   : > { %s2899_s17 = scalar_select %p214_p11, %s2761_s26, %s216_s16  }
  0x18   : > { %s3290_s18 = sand.u32 (!%p303_p10), 1, %s2757_s25   ;;  %p357_p12 = scmp.lt.s32.totalorder (!%p303_p10), %s2769_s28, 1 }
  0x19   : > { %3307 = sst [smem:[#allocation14_spill]] %s2899_s17  ;;  %s2905_s19 = sshll.u32 (!%p303_p10), %s3290_s18, 3 }
  0x1a   : > { %s2239_s20 = sshll.u32 (!%p303_p10), %s2769_s28, 1  ;;  %p377_p0 = scmp.lt.s32.totalorder (!%p303_p10), %s2765_s27, 1 }
  0x1b   : > { %p366_p13 = scmp.lt.s32.totalorder %s2239_s20, 3  ;;  %s3308_s0 = sld [smem:[#allocation15_spill]] }
  0x1c   : > { %s358_s21 = scalar_select %p357_p12, %s2769_s28, 1 }
  0x1d   : > { %s3328_s20 = smov (!%p366_p13, %s2239_s20), 3  ;;  %s356_s29 = scalar_lea.vmem [#allocation3], %s2905_s19 }
  0x1e   : > { %s2237_s22 = sshll.u32 %s358_s21, 3  ;;  %s2240_s11 = sshll.u32 %s3328_s20, 3 }
  0x1f   : > { %s364_s12 = scalar_lea.vmem %s3280_s1, %s2237_s22  ;;  %s2919_s18 = scalar_lea.vmem %s3281_s2, %s2240_s11 }
  0x20   : > { %s2924_s14 = scalar_lea.vmem %s3282_s3, %s2240_s11  ;;  %p2246_p1 = scmp.ne.s32.totalorder %s2765_s27, 0 }
  0x21   : > { %s360_s10 = scalar_lea.vmem %s3308_s0, %s2237_s22 }
  0x22   : > { %s378_s21 = scalar_select %p377_p0, %s2765_s27, 1 }
  0x23   : > { %391 = sbr.rel (%p2246_p1) target bundleno = 42 (0x2a), region = 52 }
  0x24   : > { %s2547_s24 = smul.u32 176, %s378_s21  ;;  %s2302_s8 = sshll.u32 %s378_s21, 4 }
  0x25   : > { %s2930_s0 = scalar_lea.vmem %s3284_s5, %s2302_s8 }
  0x26   : > { %s2935_s15 = scalar_lea.vmem %s3283_s4, %s2547_s24 }
  0x28   : > { %v392_v0 = vld [vmem:[%s360_s10] sm:$0xff]  ;;  %vm393_vm0 = vcmask 261120  }
  0x29   : > { %394 = vst.msk [vmem:[#allocation2] sm:$0xff] %vm393_vm0, %v392_v0 }
  0x2a PF: > { %v2627_v1 = vld [vmem:[%s2935_s15 + $0x18] sm:$0xff]   ;;  %v2783_v2 = vmov 0.0   ;;  %v2628_v3 = vld [vmem:[%s2935_s15 + $0x8] sm:$0xff]   ;;  %v2629_v4 = vld [vmem:[%s2935_s15 + $0x10] sm:$0xff]   ;;  %vm2784_vm1 = vmmov 0   ;;  %vm462_vm2 = vcmask 261120   ;;  %v446_v10 = vlaneseq }
  0x2b   : > { %2375 = vmatprep.subr.bf16.mxu1 %v2783_v2  ;;  %2367 = vmatprep.subr.bf16.mxu0 %v2783_v2  ;;  %v2630_v5 = vld [vmem:[%s2935_s15] sm:$0xff]   ;;  %vm624_vm3 = vcmask 64512   ;;  %s2785_s24 = smov 112   ;;  %s2786_s26 = smov 120   ;;  %v2631_v30 = vld [vmem:[%s2935_s15 + $0x28] sm:$0xff]   ;;  %vm687_vm4 = vcmask 1043456  }
  0x2c   : > { %2376 = vmatpush3.bf16.msra.mxu1 %v2627_v1  ;;  %2379 = vmatprep.mubr.msk.bf16.mxu1 %vm2784_vm1, %v2783_v2  ;;  %v2951_v7 = vld [vmem:[%s364_s12] sm:$0xff]  ;;  %v2965_v11 = vshrl.u32 %v446_v10, 7  ;;  %s2787_s30 = smov 104   ;;  %s2788_s8 = smov 8   ;;  %vm1080_vm5 = vcmask 130048   ;;  %vm1082_vm6 = vcmask 195584  }
  0x2d   : > { %2368 = vmatpush3.bf16.msra.mxu0 %v2628_v3  ;;  %2377 = vmatprep.subr.bf16.mxu1 %v2783_v2  ;;  %v2969_v13 = vld [vmem:[%s2930_s0] sm:$0xff]  ;;  %s2789_s11 = smov 16   ;;  %s2790_s12 = smov 24   ;;  %vm1984_vm7 = vcmask 523264  }
  0x2e   : > { %2369 = vmatprep.subr.bf16.mxu0 %v2783_v2  ;;  %2371 = vmatprep.mubr.msk.bf16.mxu0 %vm2784_vm1, %v2783_v2  ;;  %v508_v12 = vsub.s32 1, %v2965_v11  ;;  %v448_v14 = vsub.s32 0, %v2965_v11  ;;  %v2632_v31 = vld [vmem:[%s2935_s15 + $0x20] sm:$0xff]   ;;  %v564_v48 = vsub.s32 2, %v2965_v11  ;;  %p2295_p2 = scmp.ne.s32.totalorder %s2765_s27, 1 }
  0x30   : > { %v2949_v6 = vld [vmem:[#allocation2] sm:$0xff]  ;;  %2378 = vmatpush3.bf16.msra.mxu1 %v2629_v4  ;;  %v509_v15 = vrot.slane %v2969_v13, %v508_v12  ;;  %v449_v16 = vrot.slane %v2969_v13, %v448_v14  ;;  %v565_v49 = vrot.slane %v2969_v13, %v564_v48 }
  0x31   : > { %v443_v8 = vadd.f32 %v2951_v7, %v2949_v6  ;;  %2370 = vmatpush3.bf16.msra.mxu0 %v2630_v5  ;;  %2391 = vmatprep.subr.bf16.mxu1 %v2783_v2  ;;  %v445_v32 = vpack.c.bf16 %v2949_v6, %v2949_v6 }
  0x32   : > { %2383 = vmatprep.subr.bf16.mxu0 %v2783_v2 }
  0x33   : > { %v444_v9 = vpack.c.bf16 %v443_v8, %v443_v8 }
  0x35   : > { %2380 = vmatmul.mubr.msk.bf16.vlgmr.msra.gmra.mxu1 %vm462_vm2, %v444_v9  ;;  %2372 = vmatmul.mubr.msk.bf16.vlgmr.msra.gmra.mxu0 %vm462_vm2, %v444_v9 }
  0x36   : > { %2393 = vmatprep.mubr.msk.bf16.mxu1 %vm2784_vm1, %v2783_v2  ;;  %2387 = vmatprep.mubr.msk.bf16.mxu0 %vm2784_vm1, %v2783_v2 }
  0x37   : > { %2384 = vmatpush3.bf16.msra.mxu0 %v2631_v30 }
  0x38   : > { %2385 = vmatprep.subr.bf16.mxu0 %v2783_v2 }
  0x3b   : > { %2386 = vmatpush3.bf16.msra.mxu0 %v2632_v31 }
  0x3c   : > { %2397 = vmatprep.subr.bf16.mxu0 %v2783_v2 }
  0x3e   : > { %2388 = vmatmul.mubr.msk.bf16.vlgmr.msra.gmra.mxu0 %vm462_vm2, %v445_v32 }
  0x3f   : > { %2399 = vmatprep.mubr.msk.bf16.mxu0 %vm2784_vm1, %v2783_v2 }
  0xf5   : > { %v556_v17 = vpop.f32.mrf.mxu1  ;;  %v500_v19 = vpop.f32.mrf.mxu0 }
  0xf6   : > { %v557_v18 = vadd.f32 %v556_v17, %v509_v15  ;;  %v501_v20 = vadd.f32 %v500_v19, %v449_v16 }
  0xf7   : > { %v2381_v21 = vpop.f32.mrf.mxu1  ;;  %v2373_v23 = vpop.f32.mrf.mxu0 }
  0xf8   : > { %v622_v22 = vpack.c.bf16 %v557_v18, %v557_v18  ;;  %v621_v25 = vpack.c.bf16 %v501_v20, %v501_v20 }
  0xf9   : > { %v559_v24 = vpop.f32.mrf.mxu1  ;;  %v503_v26 = vpop.f32.mrf.mxu0 }
  0xfa   : > { %847 = vrot.lane.b32.xlu1 %v622_v22, %s2785_s24  ;;  %735 = vrot.lane.b32.xlu0 %v622_v22, %s2786_s26  ;;  %v629_v27 = vsel %vm624_vm3, %v622_v22, 0 }
  0xfb   : > { %v2382_v28 = vpop.f32.mrf.mxu1  ;;  %2392 = vmatpush3.bf16.xpose.msra.mxu1 %v629_v27  ;;  %v2374_v29 = vpop.f32.mrf.mxu0 }
  0xfc   : > { %2403 = vmatprep.subr.bf16.mxu1 %v2783_v2 }
  0xfe   : > { %845 = vrot.lane.b32.xlu1 %v621_v25, %s2785_s24  ;;  %732 = vrot.lane.b32.xlu0 %v621_v25, %s2786_s26  ;;  %v615_v50 = vpop.f32.mrf.mxu0 }
  0xff   : > { %v616_v51 = vadd.f32 %v615_v50, %v565_v49 }
 0x100   : > { %v2389_v52 = vpop.f32.mrf.mxu0 }
 0x101   : > { %v623_v53 = vpack.c.bf16 %v616_v51, %v616_v51 }
 0x102   : > { %956 = vrot.lane.b32.xlu1 %v621_v25, %s2787_s30  ;;  %958 = vrot.lane.b32.xlu0 %v622_v22, %s2787_s30  ;;  %v618_v54 = vpop.f32.mrf.mxu0 }
 0x103   : > { %2394 = vmatmul.mubr.msk.bf16.vlgmr.msra.gmra.mxu1 %vm624_vm3, %v621_v25  ;;  %v689_v55 = vsel %vm687_vm4, %v623_v53, 0 }
 0x104   : > { %2405 = vmatprep.mubr.msk.bf16.mxu1 %vm2784_vm1, %v2783_v2  ;;  %v2390_v56 = vpop.f32.mrf.mxu0  ;;  %2398 = vmatpush3.bf16.msra.mxu0 %v689_v55 }
 0x105   : > { %2409 = vmatprep.subr.bf16.mxu0 %v2783_v2 }
 0x16c   : > { %v736_v33 = vpop.permute.xlu0 %735  ;;  %v848_v35 = vpop.permute.xlu1 %847 }
 0x16d   : > { %v741_v34 = vsel %vm624_vm3, %v736_v33, 0  ;;  %v853_v37 = vsel %vm624_vm3, %v848_v35, 0 }
 0x16e   : > { %2404 = vmatpush3.bf16.xpose.msra.mxu1 %v741_v34 }
 0x16f   : > { %2415 = vmatprep.subr.bf16.mxu1 %v2783_v2 }
 0x170   : > { %v733_v36 = vpop.permute.xlu0 %732  ;;  %v846_v39 = vpop.permute.xlu1 %845 }
 0x174   : > { %v959_v38 = vpop.permute.xlu0 %958  ;;  %v957_v41 = vpop.permute.xlu1 %956 }
 0x175   : > { %2406 = vmatmul.mubr.msk.bf16.vlgmr.msra.gmra.mxu1 %vm624_vm3, %v733_v36  ;;  %v964_v40 = vsel %vm624_vm3, %v959_v38, 0 }
 0x176   : > { %2416 = vmatpush3.bf16.xpose.msra.mxu1 %v853_v37  ;;  %2417 = vmatprep.mubr.msk.bf16.mxu1 %vm2784_vm1, %v2783_v2 }
 0x177   : > { %2427 = vmatprep.subr.bf16.mxu1 %v2783_v2 }
 0x17d   : > { %2418 = vmatmul.mubr.msk.bf16.vlgmr.msra.gmra.mxu1 %vm624_vm3, %v846_v39 }
 0x17e   : > { %2428 = vmatpush3.bf16.xpose.msra.mxu1 %v964_v40  ;;  %2429 = vmatprep.mubr.msk.bf16.mxu1 %vm2784_vm1, %v2783_v2 }
 0x17f   : > { %2439 = vmatprep.subr.bf16.mxu1 %v2783_v2 }
 0x185   : > { %2430 = vmatmul.mubr.msk.bf16.vlgmr.msra.gmra.mxu1 %vm624_vm3, %v957_v41 }
 0x186   : > { %2443 = vmatprep.mubr.msk.bf16.mxu1 %vm2784_vm1, %v2783_v2 }
 0x1c3   : > { %v665_v42 = vpop.f32.mrf.mxu1 }
 0x1c4   : > { %v671_v43 = vmul.f32 0.35355338, %v665_v42 }
 0x1c5   : > { %v2395_v44 = vpop.f32.mrf.mxu1 }
 0x1c6   : > { %v672_v45 = vsel %vm624_vm3, %v671_v43, -inf }
 0x1c7   : > { %673 = vmax.xlane.f32.xlu0 %v672_v45  ;;  %v668_v46 = vpop.f32.mrf.mxu1 }
 0x1c9   : > { %v2396_v47 = vpop.f32.mrf.mxu1 }
 0x235   : > { %v777_v57 = vpop.f32.mrf.mxu1 }
 0x236   : > { %v783_v58 = vmul.f32 0.35355338, %v777_v57 }
 0x237   : > { %v2407_v59 = vpop.f32.mrf.mxu1 }
 0x238   : > { %v784_v60 = vsel %vm624_vm3, %v783_v58, -inf }
 0x239   : > { %785 = vmax.xlane.f32.xlu1 %v784_v60  ;;  %v780_v61 = vpop.f32.mrf.mxu1 }
 0x23b   : > { %v2408_v62 = vpop.f32.mrf.mxu1 }
 0x23d   : > { %v889_v63 = vpop.f32.mrf.mxu1 }
 0x23e   : > { %v895_v0 = vmul.f32 0.35355338, %v889_v63 }
 0x23f   : > { %v2419_v1 = vpop.f32.mrf.mxu1 }
 0x240   : > { %v896_v3 = vsel %vm624_vm3, %v895_v0, -inf  ;;  %v2633_v1 = vld [vmem:[%s2935_s15 + $0x38] sm:$0xff]  }
 0x241   : > { %897 = vmax.xlane.f32.xlu0 %v896_v3  ;;  %v892_v4 = vpop.f32.mrf.mxu1  ;;  %2440 = vmatpush3.bf16.msra.mxu1 %v2633_v1 }
 0x242   : > { %2441 = vmatprep.subr.bf16.mxu1 %v2783_v2 }
 0x243   : > { %v2420_v5 = vpop.f32.mrf.mxu1 }
 0x244   : > { %v2634_v5 = vld [vmem:[%s2935_s15 + $0x30] sm:$0xff]  }
 0x245   : > { %v1000_v8 = vpop.f32.mrf.mxu1  ;;  %2442 = vmatpush3.bf16.msra.mxu1 %v2634_v5 }
 0x246   : > { %v1006_v9 = vmul.f32 0.35355338, %v1000_v8  ;;  %2455 = vmatprep.subr.bf16.mxu1 %v2783_v2 }
 0x247   : > { %v2431_v10 = vpop.f32.mrf.mxu1 }
 0x248   : > { %v1007_v15 = vsel %vm624_vm3, %v1006_v9, -inf }
 0x249   : > { %1008 = vmax.xlane.f32.xlu0 %v1007_v15  ;;  %v1003_v16 = vpop.f32.mrf.mxu1 }
 0x24b   : > { %v2432_v17 = vpop.f32.mrf.mxu1 }
 0x250   : > { %v674_v18 = vpop.xlane.xlu0 %673 }
 0x251   : > { %v675_v19 = vsub.f32 %v671_v43, %v674_v18 }
 0x253   : > { %v676_v20 = vmul.f32 1.442695, %v675_v19 }
 0x255   : > { %2649 = vpow2.f32 %v676_v20 }
 0x262   : > { %v2650_v21 = vpop.eup %2649 }
 0x263   : > { %v678_v22 = vsel %vm624_vm3, %v2650_v21, 0.0 }
 0x264   : > { %679 = vadd.xlane.f32.xlu1 %v678_v22 }
 0x275   : > { %797 = vrot.lane.b32.xlu1 %v623_v53, %s2786_s26 }
 0x2c2   : > { %v786_v23 = vpop.xlane.xlu1 %785 }
 0x2c3   : > { %v787_v24 = vsub.f32 %v783_v58, %v786_v23 }
 0x2c5   : > { %v788_v25 = vmul.f32 1.442695, %v787_v24 }
 0x2c7   : > { %2651 = vpow2.f32 %v788_v25 }
 0x2ca   : > { %v898_v26 = vpop.xlane.xlu0 %897 }
 0x2cb   : > { %v899_v27 = vsub.f32 %v895_v0, %v898_v26 }
 0x2cd   : > { %v900_v28 = vmul.f32 1.442695, %v899_v27 }
 0x2cf   : > { %2653 = vpow2.f32 %v900_v28 }
 0x2d2   : > { %v1009_v29 = vpop.xlane.xlu0 %1008 }
 0x2d3   : > { %v1010_v30 = vsub.f32 %v1006_v9, %v1009_v29  ;;  %v1087_v29 = vsub.s32 3, %v2965_v11 }
 0x2d4   : > { %v2652_v31 = vpop.eup %2651 }
 0x2d5   : > { %v1011_v32 = vmul.f32 1.442695, %v1010_v30  ;;  %v790_v33 = vsel %vm624_vm3, %v2652_v31, 0.0  ;;  %v1088_v30 = vrot.slane %v2969_v13, %v1087_v29 }
 0x2d6   : > { %791 = vadd.xlane.f32.xlu0 %v790_v33 }
 0x2d7   : > { %2655 = vpow2.f32 %v1011_v32 }
 0x2dc   : > { %v2654_v34 = vpop.eup %2653 }
 0x2dd   : > { %v902_v35 = vsel %vm624_vm3, %v2654_v34, 0.0 }
 0x2de   : > { %903 = vadd.xlane.f32.xlu1 %v902_v35 }
 0x2e4   : > { %v2656_v36 = vpop.eup %2655 }
 0x2e5   : > { %v1013_v37 = vsel %vm624_vm3, %v2656_v36, 0.0 }
 0x2e6   : > { %1014 = vadd.xlane.f32.xlu0 %v1013_v37 }
 0x2ed   : > { %v680_v38 = vpop.xlane.xlu1 %679 }
 0x2ee   : > { %2657 = vrcp.f32 %v680_v38 }
 0x2ef   : > { %1019 = vrot.lane.b32.xlu1 %v623_v53, %s2787_s30 }
 0x2f1   : > { %v798_v40 = vpop.permute.xlu1 %797 }
 0x2f2   : > { %v803_v43 = vsel %vm687_vm4, %v798_v40, 0  ;;  %v2635_v40 = vld [vmem:[%s2935_s15 + $0x58] sm:$0xff]  }
 0x2fb   : > { %v2658_v39 = vpop.eup %2657 }
 0x2fc   : > { %908 = vrot.lane.b32.xlu0 %v623_v53, %s2785_s24  ;;  %v682_v41 = vmul.f32 %v2658_v39, %v2650_v21 }
 0x2fe   : > { %v683_v42 = vpack.c.bf16 %v682_v41, %v682_v41  ;;  %v2636_v41 = vld [vmem:[%s2935_s15 + $0x50] sm:$0xff]  }
 0x300   : > { %2400 = vmatmul.mubr.msk.bf16.vlgmr.msra.gmra.mxu0 %vm624_vm3, %v683_v42  ;;  %v1232_v42 = vld [vmem:[%s2924_s14] sm:$0xff] }
 0x301   : > { %2410 = vmatpush3.bf16.msra.mxu0 %v803_v43  ;;  %2411 = vmatprep.mubr.msk.bf16.mxu0 %vm2784_vm1, %v2783_v2  ;;  %v1233_v43 = vld [vmem:[%s2924_s14 + $0x8] sm:$0xff] }
 0x302   : > { %2421 = vmatprep.subr.bf16.mxu0 %v2783_v2 }
 0x35f   : > { %v792_v44 = vpop.xlane.xlu0 %791 }
 0x360   : > { %2659 = vrcp.f32 %v792_v44  ;;  %v2637_v44 = vld [vmem:[%s2935_s15 + $0x48] sm:$0xff]  }
 0x367   : > { %v904_v45 = vpop.xlane.xlu1 %903 }
 0x368   : > { %2661 = vrcp.f32 %v904_v45  ;;  %v2638_v45 = vld [vmem:[%s2935_s15 + $0x40] sm:$0xff]  }
 0x36b   : > { %v1020_v55 = vpop.permute.xlu1 %1019 }
 0x36c   : > { %v1025_v57 = vsel %vm687_vm4, %v1020_v55, 0 }
 0x36d   : > { %v2660_v46 = vpop.eup %2659 }
 0x36e   : > { %v794_v47 = vmul.f32 %v2660_v46, %v2652_v31 }
 0x36f   : > { %v1015_v49 = vpop.xlane.xlu0 %1014 }
 0x370   : > { %2663 = vrcp.f32 %v1015_v49  ;;  %v795_v50 = vpack.c.bf16 %v794_v47, %v794_v47 }
 0x372   : > { %2412 = vmatmul.mubr.msk.bf16.vlgmr.msra.gmra.mxu0 %vm624_vm3, %v795_v50 }
 0x373   : > { %v909_v51 = vpop.permute.xlu0 %908  ;;  %2423 = vmatprep.mubr.msk.bf16.mxu0 %vm2784_vm1, %v2783_v2 }
 0x374   : > { %v914_v52 = vsel %vm687_vm4, %v909_v51, 0 }
 0x375   : > { %v2662_v53 = vpop.eup %2661  ;;  %2422 = vmatpush3.bf16.msra.mxu0 %v914_v52 }
 0x376   : > { %2433 = vmatprep.subr.bf16.mxu0 %v2783_v2  ;;  %v906_v54 = vmul.f32 %v2662_v53, %v2654_v34 }
 0x378   : > { %v907_v56 = vpack.c.bf16 %v906_v54, %v906_v54  ;;  %v3080_v54 = vld [vmem:[%s2930_s0 + $0x8] sm:$0xff] }
 0x379   : > { %v1164_v55 = vrot.slane %v3080_v54, %v564_v48 }
 0x37a   : > { %2424 = vmatmul.mubr.msk.bf16.vlgmr.msra.gmra.mxu0 %vm624_vm3, %v907_v56 }
 0x37b   : > { %2434 = vmatpush3.bf16.msra.mxu0 %v1025_v57  ;;  %2435 = vmatprep.mubr.msk.bf16.mxu0 %vm2784_vm1, %v2783_v2 }
 0x37c   : > { %2447 = vmatprep.subr.bf16.mxu0 %v2783_v2 }
 0x37d   : > { %v2664_v58 = vpop.eup %2663 }
 0x37e   : > { %v1017_v59 = vmul.f32 %v2664_v58, %v2656_v36  ;;  %v1169_v58 = vrot.slane %v3080_v54, %v1087_v29 }
 0x380   : > { %v1018_v60 = vpack.c.bf16 %v1017_v59, %v1017_v59 }
 0x382   : > { %2436 = vmatmul.mubr.msk.bf16.vlgmr.msra.gmra.mxu0 %vm624_vm3, %v1018_v60 }
 0x383   : > { %2451 = vmatprep.mubr.msk.bf16.mxu0 %vm2784_vm1, %v2783_v2  ;;  %2448 = vmatpush3.bf16.msra.mxu0 %v2637_v44 }
 0x384   : > { %2449 = vmatprep.subr.bf16.mxu0 %v2783_v2 }
 0x387   : > { %2450 = vmatpush3.bf16.msra.mxu0 %v2638_v45 }
 0x388   : > { %2463 = vmatprep.subr.bf16.mxu0 %v2783_v2 }
 0x3c0   : > { %v725_v61 = vpop.f32.mrf.mxu0 }
 0x3c2   : > { %v2401_v62 = vpop.f32.mrf.mxu0 }
 0x3c4   : > { %v728_v63 = vpop.f32.mrf.mxu0 }
 0x3c6   : > { %v2402_v0 = vpop.f32.mrf.mxu0 }
 0x3c7   : > { %v1237_v0 = vsub.s32 5, %v2965_v11 }
 0x3c9   : > { %v1238_v48 = vrot.slane %v2969_v13, %v1237_v0 }
 0x432   : > { %v839_v3 = vpop.f32.mrf.mxu0 }
 0x433   : > { %1068 = vrot.lane.b32.xlu1 %v839_v3, %s2788_s8 }
 0x434   : > { %v2413_v4 = vpop.f32.mrf.mxu0 }
 0x436   : > { %v842_v8 = vpop.f32.mrf.mxu0 }
 0x438   : > { %v2414_v9 = vpop.f32.mrf.mxu0 }
 0x43a   : > { %v950_v10 = vpop.f32.mrf.mxu0 }
 0x43b   : > { %1072 = vrot.lane.b32.xlu0 %v950_v10, %s2789_s11 }
 0x43c   : > { %v2425_v15 = vpop.f32.mrf.mxu0 }
 0x43d   : > { %v1175_v15 = vsub.s32 4, %v2965_v11 }
 0x43e   : > { %v953_v16 = vpop.f32.mrf.mxu0 }
 0x43f   : > { %v1176_v16 = vrot.slane %v2969_v13, %v1175_v15 }
 0x440   : > { %v2426_v17 = vpop.f32.mrf.mxu0 }
 0x442   : > { %v1061_v18 = vpop.f32.mrf.mxu0 }
 0x443   : > { %1076 = vrot.lane.b32.xlu1 %v1061_v18, %s2790_s12 }
 0x444   : > { %v2437_v19 = vpop.f32.mrf.mxu0 }
 0x446   : > { %v1064_v20 = vpop.f32.mrf.mxu0 }
 0x448   : > { %v2438_v21 = vpop.f32.mrf.mxu0 }
 0x4a5   : > { %v1069_v22 = vpop.permute.xlu1 %1068 }
 0x4a6   : > { %v1079_v24 = vsel %vm624_vm3, %v725_v61, %v1069_v22 }
 0x4ad   : > { %v1073_v23 = vpop.permute.xlu0 %1072 }
 0x4ae   : > { %v1081_v25 = vsel %vm1080_vm5, %v1079_v24, %v1073_v23 }
 0x4b5   : > { %v1077_v26 = vpop.permute.xlu1 %1076 }
 0x4b6   : > { %v1083_v27 = vsel %vm1082_vm6, %v1081_v25, %v1077_v26  ;;  %v2639_v25 = vld [vmem:[%s2935_s15 + $0x68] sm:$0xff]   ;;  %v2640_v26 = vld [vmem:[%s2935_s15 + $0x60] sm:$0xff]  }
 0x4b7   : > { %v1084_v28 = vpack.c.bf16 %v1083_v27, %v1083_v27  ;;  %v1295_v27 = vld [vmem:[%s2919_s18] sm:$0xff] }
 0x4b9   : > { %2444 = vmatmul.mubr.msk.bf16.vlgmr.msra.gmra.mxu1 %vm462_vm2, %v1084_v28  ;;  %v1296_v28 = vld [vmem:[%s2919_s18 + $0x8] sm:$0xff] }
 0x4ba   : > { %2459 = vmatprep.mubr.msk.bf16.mxu1 %vm2784_vm1, %v2783_v2  ;;  %2456 = vmatpush3.bf16.msra.mxu1 %v2635_v40  ;;  %v1297_v29 = vpack.c.bf16 %v1296_v28, %v1295_v27 }
 0x4bb   : > { %2457 = vmatprep.subr.bf16.mxu1 %v2783_v2 }
 0x4be   : > { %2458 = vmatpush3.bf16.msra.mxu1 %v2636_v41 }
 0x4bf   : > { %2471 = vmatprep.subr.bf16.mxu1 %v2783_v2 }
 0x579   : > { %v1138_v31 = vpop.f32.mrf.mxu1 }
 0x57a   : > { %v1139_v32 = vadd.f32 %v1138_v31, %v1088_v30 }
 0x57b   : > { %v2445_v33 = vpop.f32.mrf.mxu1 }
 0x57c   : > { %v1144_v34 = vadd.f32 %v1139_v32, %v2949_v6  ;;  %v1234_v6 = vpack.c.bf16 %v1233_v43, %v1232_v42  ;;  %v1300_v43 = vsub.s32 6, %v2965_v11 }
 0x57d   : > { %v1141_v35 = vpop.f32.mrf.mxu1 }
 0x57e   : > { %v1145_v36 = vsel %vm462_vm2, %v1144_v34, 0.0  ;;  %v1150_v37 = vmul.f32 %v1144_v34, %v1144_v34  ;;  %2460 = vmatmul.mubr.msk.bf16.vlgmr.msra.gmra.mxu1 %vm462_vm2, %v1234_v6  ;;  %v1301_v6 = vrot.slane %v2969_v13, %v1300_v43 }
 0x57f   : > { %1146 = vadd.xlane.f32.xlu0 %v1145_v36  ;;  %v2446_v38 = vpop.f32.mrf.mxu1  ;;  %2473 = vmatprep.mubr.msk.bf16.mxu1 %vm2784_vm1, %v2783_v2 }
 0x580   : > { %v1151_v39 = vsel %vm462_vm2, %v1150_v37, 0.0 }
 0x581   : > { %1152 = vadd.xlane.f32.xlu1 %v1151_v39 }
 0x608   : > { %v1147_v46 = vpop.xlane.xlu0 %1146 }
 0x609   : > { %v1149_v47 = vmul.f32 0.03125, %v1147_v46 }
 0x60a   : > { %v1153_v49 = vpop.xlane.xlu1 %1152 }
 0x60b   : > { %v1155_v50 = vmul.f32 %v1149_v47, %v1149_v47  ;;  %v1154_v51 = vmul.f32 0.03125, %v1153_v49  ;;  %v1157_v56 = vsub.f32 %v1144_v34, %v1149_v47 }
 0x60d   : > { %v1156_v52 = vsub.f32 %v1154_v51, %v1155_v50 }
 0x60f   : > { %v1158_v53 = vadd.f32 1e-05, %v1156_v52 }
 0x611   : > { %2665 = vrsqrt.f32 %v1158_v53 }
 0x61e   : > { %v2666_v57 = vpop.eup %2665 }
 0x61f   : > { %v1160_v59 = vmul.f32 %v2666_v57, %v1157_v56 }
 0x621   : > { %v1165_v60 = vmul.f32 %v1164_v55, %v1160_v59 }
 0x623   : > { %v3086_v61 = vadd.f32 %v1169_v58, %v1165_v60 }
 0x625   : > { %v1171_v62 = vadd.f32 %v3086_v61, %v2951_v7 }
 0x627   : > { %v1172_v63 = vpack.c.bf16 %v1171_v62, %v1171_v62 }
 0x629   : > { %2452 = vmatmul.mubr.msk.bf16.vlgmr.msra.gmra.mxu0 %vm462_vm2, %v1172_v63 }
 0x62a   : > { %2467 = vmatprep.mubr.msk.bf16.mxu0 %vm2784_vm1, %v2783_v2  ;;  %2464 = vmatpush3.bf16.msra.mxu0 %v2639_v25 }
 0x62b   : > { %2465 = vmatprep.subr.bf16.mxu0 %v2783_v2 }
 0x62e   : > { %2466 = vmatpush3.bf16.msra.mxu0 %v2640_v26 }
 0x62f   : > { %2477 = vmatprep.subr.bf16.mxu0 %v2783_v2 }
 0x631   : > { %2468 = vmatmul.mubr.msk.bf16.vlgmr.msra.gmra.mxu0 %vm462_vm2, %v1297_v29 }
 0x632   : > { %2479 = vmatprep.mubr.msk.bf16.mxu0 %vm2784_vm1, %v2783_v2 }
 0x63e   : > { %v1288_v1 = vpop.f32.mrf.mxu1 }
 0x63f   : > { %v1289_v4 = vadd.f32 %v1288_v1, %v1238_v48 }
 0x640   : > { %v2461_v3 = vpop.f32.mrf.mxu1 }
 0x642   : > { %v1291_v5 = vpop.f32.mrf.mxu1 }
 0x643   : > { %v1292_v8 = vadd.f32 %v1291_v5, %v1238_v48 }
 0x644   : > { %v2462_v9 = vpop.f32.mrf.mxu1 }
 0x645   : > { %v1359_v10 = vpack.c.bf16 %v1292_v8, %v1289_v4 }
 0x647   : > { %1467 = vrot.lane.b32.xlu0 %v1359_v10, %s2786_s26  ;;  %v1365_v7 = vsel %vm624_vm3, %v1359_v10, 0 }
 0x648   : > { %2472 = vmatpush3.bf16.xpose.msra.mxu1 %v1365_v7 }
 0x649   : > { %2483 = vmatprep.subr.bf16.mxu1 %v2783_v2 }
 0x64b   : > { %1577 = vrot.lane.b32.xlu0 %v1359_v10, %s2785_s24 }
 0x64f   : > { %1686 = vrot.lane.b32.xlu0 %v1359_v10, %s2787_s30 }
 0x6b9   : > { %v1468_v20 = vpop.permute.xlu0 %1467 }
 0x6ba   : > { %v1473_v22 = vsel %vm624_vm3, %v1468_v20, 0 }
 0x6bd   : > { %v1578_v30 = vpop.permute.xlu0 %1577 }
 0x6be   : > { %v1583_v32 = vsel %vm624_vm3, %v1578_v30, 0 }
 0x6c1   : > { %v1687_v33 = vpop.permute.xlu0 %1686 }
 0x6c2   : > { %v1692_v35 = vsel %vm624_vm3, %v1687_v33, 0 }
 0x6e9   : > { %v1226_v17 = vpop.f32.mrf.mxu0 }
 0x6ea   : > { %v1227_v18 = vadd.f32 %v1226_v17, %v1176_v16 }
 0x6eb   : > { %v2453_v19 = vpop.f32.mrf.mxu0 }
 0x6ec   : > { %v1358_v21 = vpack.c.bf16 %v1227_v18, %v1227_v18 }
 0x6ed   : > { %v1229_v23 = vpop.f32.mrf.mxu0 }
 0x6ee   : > { %1464 = vrot.lane.b32.xlu1 %v1358_v21, %s2786_s26  ;;  %2474 = vmatmul.mubr.msk.bf16.vlgmr.msra.gmra.mxu1 %vm624_vm3, %v1358_v21 }
 0x6ef   : > { %v2454_v24 = vpop.f32.mrf.mxu0  ;;  %2484 = vmatpush3.bf16.xpose.msra.mxu1 %v1473_v22  ;;  %2485 = vmatprep.mubr.msk.bf16.mxu1 %vm2784_vm1, %v2783_v2 }
 0x6f0   : > { %2495 = vmatprep.subr.bf16.mxu1 %v2783_v2 }
 0x6f1   : > { %v1351_v44 = vpop.f32.mrf.mxu0 }
 0x6f2   : > { %1575 = vrot.lane.b32.xlu1 %v1358_v21, %s2785_s24  ;;  %v1352_v46 = vadd.f32 %v1351_v44, %v1301_v6 }
 0x6f3   : > { %v2469_v45 = vpop.f32.mrf.mxu0 }
 0x6f5   : > { %v1354_v47 = vpop.f32.mrf.mxu0 }
 0x6f6   : > { %1684 = vrot.lane.b32.xlu1 %v1358_v21, %s2787_s30  ;;  %v1355_v49 = vadd.f32 %v1354_v47, %v1301_v6 }
 0x6f7   : > { %v2470_v50 = vpop.f32.mrf.mxu0 }
 0x6f8   : > { %v1360_v51 = vpack.c.bf16 %v1355_v49, %v1352_v46 }
 0x6fa   : > { %2478 = vmatpush3.bf16.msra.mxu0 %v1360_v51 }
 0x6fb   : > { %2489 = vmatprep.subr.bf16.mxu0 %v2783_v2 }
 0x760   : > { %v1465_v31 = vpop.permute.xlu1 %1464 }
 0x761   : > { %2486 = vmatmul.mubr.msk.bf16.vlgmr.msra.gmra.mxu1 %vm624_vm3, %v1465_v31 }
 0x762   : > { %2496 = vmatpush3.bf16.xpose.msra.mxu1 %v1583_v32  ;;  %2497 = vmatprep.mubr.msk.bf16.mxu1 %vm2784_vm1, %v2783_v2 }
 0x763   : > { %2507 = vmatprep.subr.bf16.mxu1 %v2783_v2 }
 0x764   : > { %v1576_v34 = vpop.permute.xlu1 %1575 }
 0x768   : > { %v1685_v36 = vpop.permute.xlu1 %1684 }
 0x769   : > { %2498 = vmatmul.mubr.msk.bf16.vlgmr.msra.gmra.mxu1 %vm624_vm3, %v1576_v34 }
 0x76a   : > { %2508 = vmatpush3.bf16.xpose.msra.mxu1 %v1692_v35  ;;  %2509 = vmatprep.mubr.msk.bf16.mxu1 %vm2784_vm1, %v2783_v2 }
 0x76b   : > { %2519 = vmatprep.subr.bf16.mxu1 %v2783_v2 }
 0x771   : > { %2510 = vmatmul.mubr.msk.bf16.vlgmr.msra.gmra.mxu1 %vm624_vm3, %v1685_v36 }
 0x772   : > { %2523 = vmatprep.mubr.msk.bf16.mxu1 %vm2784_vm1, %v2783_v2 }
 0x7ae   : > { %v1401_v37 = vpop.f32.mrf.mxu1 }
 0x7af   : > { %v1407_v38 = vmul.f32 0.35355338, %v1401_v37 }
 0x7b0   : > { %v2475_v39 = vpop.f32.mrf.mxu1 }
 0x7b1   : > { %v1408_v40 = vsel %vm1080_vm5, %v1407_v38, -inf }
 0x7b2   : > { %1409 = vmax.xlane.f32.xlu0 %v1408_v40  ;;  %v1404_v41 = vpop.f32.mrf.mxu1 }
 0x7b4   : > { %v2476_v42 = vpop.f32.mrf.mxu1 }
 0x821   : > { %v1509_v52 = vpop.f32.mrf.mxu1 }
 0x822   : > { %v1515_v53 = vmul.f32 0.35355338, %v1509_v52 }
 0x823   : > { %v2487_v55 = vpop.f32.mrf.mxu1 }
 0x824   : > { %v1516_v56 = vsel %vm1080_vm5, %v1515_v53, -inf }
 0x825   : > { %1517 = vmax.xlane.f32.xlu1 %v1516_v56  ;;  %v1512_v57 = vpop.f32.mrf.mxu1 }
 0x827   : > { %v2488_v58 = vpop.f32.mrf.mxu1 }
 0x829   : > { %v1619_v59 = vpop.f32.mrf.mxu1 }
 0x82a   : > { %v1625_v60 = vmul.f32 0.35355338, %v1619_v59 }
 0x82b   : > { %v2499_v62 = vpop.f32.mrf.mxu1 }
 0x82c   : > { %v1626_v63 = vsel %vm1080_vm5, %v1625_v60, -inf }
 0x82d   : > { %1627 = vmax.xlane.f32.xlu0 %v1626_v63  ;;  %v1622_v48 = vpop.f32.mrf.mxu1 }
 0x82e   : > { %v2642_v48 = vld [vmem:[%s2935_s15 + $0x70] sm:$0xff]  }
 0x82f   : > { %v2500_v1 = vpop.f32.mrf.mxu1 }
 0x831   : > { %v1728_v3 = vpop.f32.mrf.mxu1 }
 0x832   : > { %v1734_v4 = vmul.f32 0.35355338, %v1728_v3 }
 0x833   : > { %v2511_v5 = vpop.f32.mrf.mxu1 }
 0x834   : > { %v1735_v8 = vsel %vm1080_vm5, %v1734_v4, -inf }
 0x835   : > { %1736 = vmax.xlane.f32.xlu0 %v1735_v8  ;;  %v1731_v9 = vpop.f32.mrf.mxu1 }
 0x837   : > { %v2512_v10 = vpop.f32.mrf.mxu1 }
 0x83b   : > { %v1410_v7 = vpop.xlane.xlu0 %1409 }
 0x83c   : > { %v1411_v16 = vsub.f32 %v1407_v38, %v1410_v7 }
 0x83e   : > { %v1412_v17 = vmul.f32 1.442695, %v1411_v16 }
 0x840   : > { %2667 = vpow2.f32 %v1412_v17 }
 0x84d   : > { %v2668_v18 = vpop.eup %2667 }
 0x84e   : > { %v1414_v19 = vsel %vm1080_vm5, %v2668_v18, 0.0 }
 0x84f   : > { %1415 = vadd.xlane.f32.xlu1 %v1414_v19 }
 0x860   : > { %1529 = vrot.lane.b32.xlu1 %v1360_v51, %s2786_s26 }
 0x8ae   : > { %v1518_v20 = vpop.xlane.xlu1 %1517 }
 0x8af   : > { %v1519_v21 = vsub.f32 %v1515_v53, %v1518_v20 }
 0x8b1   : > { %v1520_v22 = vmul.f32 1.442695, %v1519_v21 }
 0x8b3   : > { %2669 = vpow2.f32 %v1520_v22 }
 0x8b6   : > { %v1628_v23 = vpop.xlane.xlu0 %1627 }
 0x8b7   : > { %v1629_v24 = vsub.f32 %v1625_v60, %v1628_v23  ;;  %v2641_v60 = vld [vmem:[%s2935_s15 + $0x78] sm:$0xff]  }
 0x8b8   : > { %2520 = vmatpush3.bf16.msra.mxu1 %v2641_v60 }
 0x8b9   : > { %v1630_v25 = vmul.f32 1.442695, %v1629_v24  ;;  %2521 = vmatprep.subr.bf16.mxu1 %v2783_v2 }
 0x8bb   : > { %2671 = vpow2.f32 %v1630_v25  ;;  %v1811_v25 = vsub.s32 7, %v2965_v11 }
 0x8bc   : > { %2522 = vmatpush3.bf16.msra.mxu1 %v2642_v48  ;;  %v1959_v48 = vrot.slane %v3080_v54, %v508_v12 }
 0x8bd   : > { %2535 = vmatprep.subr.bf16.mxu1 %v2783_v2 }
 0x8be   : > { %v1737_v26 = vpop.xlane.xlu0 %1736 }
 0x8bf   : > { %v1738_v27 = vsub.f32 %v1734_v4, %v1737_v26  ;;  %v1812_v26 = vrot.slane %v2969_v13, %v1811_v25  ;;  %v2645_v13 = vld [vmem:[%s2935_s15 + $0xa8] sm:$0xff]  }
 0x8c0   : > { %v2670_v28 = vpop.eup %2669 }
 0x8c1   : > { %v1739_v29 = vmul.f32 1.442695, %v1738_v27  ;;  %v1522_v30 = vsel %vm1080_vm5, %v2670_v28, 0.0 }
 0x8c2   : > { %1523 = vadd.xlane.f32.xlu0 %v1522_v30 }
 0x8c3   : > { %2673 = vpow2.f32 %v1739_v29 }
 0x8c8   : > { %v2672_v31 = vpop.eup %2671 }
 0x8c9   : > { %v1632_v32 = vsel %vm1080_vm5, %v2672_v31, 0.0 }
 0x8ca   : > { %1633 = vadd.xlane.f32.xlu1 %v1632_v32 }
 0x8d0   : > { %v2674_v33 = vpop.eup %2673 }
 0x8d1   : > { %v1741_v34 = vsel %vm1080_vm5, %v2674_v33, 0.0 }
 0x8d2   : > { %1742 = vadd.xlane.f32.xlu0 %v1741_v34 }
 0x8d8   : > { %v1416_v35 = vpop.xlane.xlu1 %1415 }
 0x8d9   : > { %2675 = vrcp.f32 %v1416_v35 }
 0x8db   : > { %1747 = vrot.lane.b32.xlu1 %v1360_v51, %s2787_s30 }
 0x8dc   : > { %v1530_v39 = vpop.permute.xlu1 %1529 }
 0x8e6   : > { %v2676_v36 = vpop.eup %2675 }
 0x8e7   : > { %v1418_v37 = vmul.f32 %v2676_v36, %v2668_v18  ;;  %v2643_v36 = vld [vmem:[%s2935_s15 + $0x88] sm:$0xff]  }
 0x8e8   : > { %1638 = vrot.lane.b32.xlu0 %v1360_v51, %s2785_s24 }
 0x8e9   : > { %v1419_v38 = vpack.c.bf16 %v1418_v37, %v1418_v37  ;;  %v2644_v37 = vld [vmem:[%s2935_s15 + $0x80] sm:$0xff]  }
 0x8eb   : > { %2480 = vmatmul.mubr.msk.bf16.vlgmr.msra.gmra.mxu0 %vm1080_vm5, %v1419_v38  ;;  %v2646_v38 = vld [vmem:[%s2935_s15 + $0xa0] sm:$0xff]  }
 0x8ec   : > { %2490 = vmatpush3.bf16.msra.mxu0 %v1530_v39  ;;  %2491 = vmatprep.mubr.msk.bf16.mxu0 %vm2784_vm1, %v2783_v2 }
 0x8ed   : > { %2501 = vmatprep.subr.bf16.mxu0 %v2783_v2 }
 0x94b   : > { %v1524_v40 = vpop.xlane.xlu0 %1523 }
 0x94c   : > { %2677 = vrcp.f32 %v1524_v40 }
 0x953   : > { %v1634_v41 = vpop.xlane.xlu1 %1633 }
 0x954   : > { %2679 = vrcp.f32 %v1634_v41 }
 0x957   : > { %v1748_v51 = vpop.permute.xlu1 %1747 }
 0x959   : > { %v2678_v42 = vpop.eup %2677 }
 0x95a   : > { %v1526_v6 = vmul.f32 %v2678_v42, %v2670_v28 }
 0x95b   : > { %v1743_v44 = vpop.xlane.xlu0 %1742 }
 0x95c   : > { %2681 = vrcp.f32 %v1743_v44  ;;  %v1527_v45 = vpack.c.bf16 %v1526_v6, %v1526_v6 }
 0x95e   : > { %2492 = vmatmul.mubr.msk.bf16.vlgmr.msra.gmra.mxu0 %vm1080_vm5, %v1527_v45  ;;  %v1887_v45 = vrot.slane %v3080_v54, %v1175_v15  ;;  %v1898_v15 = vrot.slane %v3080_v54, %v448_v14 }
 0x95f   : > { %v1639_v46 = vpop.permute.xlu0 %1638  ;;  %2503 = vmatprep.mubr.msk.bf16.mxu0 %vm2784_vm1, %v2783_v2 }
 0x960   : > { %2502 = vmatpush3.bf16.msra.mxu0 %v1639_v46 }
 0x961   : > { %v2680_v47 = vpop.eup %2679  ;;  %2513 = vmatprep.subr.bf16.mxu0 %v2783_v2 }
 0x962   : > { %v1636_v49 = vmul.f32 %v2680_v47, %v2672_v31 }
 0x964   : > { %v1637_v50 = vpack.c.bf16 %v1636_v49, %v1636_v49  ;;  %v1892_v49 = vrot.slane %v3080_v54, %v1237_v0 }
 0x966   : > { %2504 = vmatmul.mubr.msk.bf16.vlgmr.msra.gmra.mxu0 %vm1080_vm5, %v1637_v50 }
 0x967   : > { %2514 = vmatpush3.bf16.msra.mxu0 %v1748_v51  ;;  %2515 = vmatprep.mubr.msk.bf16.mxu0 %vm2784_vm1, %v2783_v2 }
 0x968   : > { %2527 = vmatprep.subr.bf16.mxu0 %v2783_v2 }
 0x969   : > { %v2682_v52 = vpop.eup %2681 }
 0x96a   : > { %v1745_v53 = vmul.f32 %v2682_v52, %v2674_v33 }
 0x96c   : > { %v1746_v55 = vpack.c.bf16 %v1745_v53, %v1745_v53 }
 0x96e   : > { %2516 = vmatmul.mubr.msk.bf16.vlgmr.msra.gmra.mxu0 %vm1080_vm5, %v1746_v55  ;;  %v2647_v55 = vld [vmem:[%s2935_s15 + $0x98] sm:$0xff]  }
 0x96f   : > { %2531 = vmatprep.mubr.msk.bf16.mxu0 %vm2784_vm1, %v2783_v2  ;;  %2528 = vmatpush3.bf16.msra.mxu0 %v2643_v36 }
 0x970   : > { %2529 = vmatprep.subr.bf16.mxu0 %v2783_v2 }
 0x973   : > { %2530 = vmatpush3.bf16.msra.mxu0 %v2644_v37 }
 0x9ab   : > { %v1457_v56 = vpop.f32.mrf.mxu0 }
 0x9ad   : > { %v2481_v57 = vpop.f32.mrf.mxu0 }
 0x9af   : > { %v1460_v58 = vpop.f32.mrf.mxu0 }
 0x9b1   : > { %v2482_v59 = vpop.f32.mrf.mxu0 }
 0xa1e   : > { %v1569_v62 = vpop.f32.mrf.mxu0 }
 0xa1f   : > { %1794 = vrot.lane.b32.xlu1 %v1569_v62, %s2788_s8 }
 0xa20   : > { %v2493_v63 = vpop.f32.mrf.mxu0 }
 0xa22   : > { %v1572_v1 = vpop.f32.mrf.mxu0 }
 0xa24   : > { %v2494_v3 = vpop.f32.mrf.mxu0 }
 0xa26   : > { %v1678_v4 = vpop.f32.mrf.mxu0 }
 0xa27   : > { %1798 = vrot.lane.b32.xlu0 %v1678_v4, %s2789_s11 }
 0xa28   : > { %v2505_v5 = vpop.f32.mrf.mxu0 }
 0xa2a   : > { %v1681_v8 = vpop.f32.mrf.mxu0 }
 0xa2c   : > { %v2506_v9 = vpop.f32.mrf.mxu0 }
 0xa2e   : > { %v1787_v10 = vpop.f32.mrf.mxu0 }
 0xa2f   : > { %1802 = vrot.lane.b32.xlu1 %v1787_v10, %s2790_s12 }
 0xa30   : > { %v2517_v7 = vpop.f32.mrf.mxu0 }
 0xa32   : > { %v1790_v16 = vpop.f32.mrf.mxu0 }
 0xa34   : > { %v2518_v17 = vpop.f32.mrf.mxu0 }
 0xa91   : > { %v1795_v18 = vpop.permute.xlu1 %1794 }
 0xa92   : > { %v1805_v20 = vsel %vm624_vm3, %v1457_v56, %v1795_v18  ;;  %v2648_v56 = vld [vmem:[%s2935_s15 + $0x90] sm:$0xff]  }
 0xa99   : > { %v1799_v19 = vpop.permute.xlu0 %1798 }
 0xa9a   : > { %v1806_v21 = vsel %vm1080_vm5, %v1805_v20, %v1799_v19 }
 0xaa1   : > { %v1803_v22 = vpop.permute.xlu1 %1802 }
 0xaa2   : > { %v1807_v23 = vsel %vm1082_vm6, %v1806_v21, %v1803_v22  ;;  %v2047_v21 = vrot.slane %v3080_v54, %v1300_v43 }
 0xaa3   : > { %v1808_v24 = vpack.c.bf16 %v1807_v23, %v1807_v23 }
 0xaa5   : > { %2524 = vmatmul.mubr.msk.bf16.vlgmr.msra.gmra.mxu1 %vm462_vm2, %v1808_v24  ;;  %v2052_v24 = vrot.slane %v3080_v54, %v1811_v25 }
 0xaa6   : > { %2543 = vmatprep.mubr.msk.bf16.mxu1 %vm2784_vm1, %v2783_v2  ;;  %2536 = vmatpush3.bf16.msra.mxu1 %v2645_v13 }
 0xaa7   : > { %2537 = vmatprep.subr.bf16.mxu1 %v2783_v2 }
 0xaaa   : > { %2538 = vmatpush3.bf16.msra.mxu1 %v2646_v38 }
 0xaab   : > { %2539 = vmatprep.subr.bf16.mxu1 %v2783_v2 }
 0xaae   : > { %2540 = vmatpush3.bf16.msra.mxu1 %v2647_v55 }
 0xaaf   : > { %2541 = vmatprep.subr.bf16.mxu1 %v2783_v2 }
 0xab2   : > { %2542 = vmatpush3.bf16.msra.mxu1 %v2648_v56 }
 0xb65   : > { %v1862_v27 = vpop.f32.mrf.mxu1 }
 0xb66   : > { %v1863_v28 = vadd.f32 %v1862_v27, %v1812_v26 }
 0xb67   : > { %v2525_v29 = vpop.f32.mrf.mxu1 }
 0xb68   : > { %v1868_v30 = vadd.f32 %v1863_v28, %v3086_v61 }
 0xb69   : > { %v1865_v31 = vpop.f32.mrf.mxu1 }
 0xb6a   : > { %v1869_v32 = vsel %vm462_vm2, %v1868_v30, 0.0  ;;  %v1873_v33 = vmul.f32 %v1868_v30, %v1868_v30 }
 0xb6b   : > { %1870 = vadd.xlane.f32.xlu0 %v1869_v32  ;;  %v2526_v34 = vpop.f32.mrf.mxu1 }
 0xb6c   : > { %v1874_v35 = vsel %vm462_vm2, %v1873_v33, 0.0 }
 0xb6d   : > { %1875 = vadd.xlane.f32.xlu1 %v1874_v35 }
 0xbf4   : > { %v1871_v61 = vpop.xlane.xlu0 %1870 }
 0xbf5   : > { %v1872_v39 = vmul.f32 0.03125, %v1871_v61 }
 0xbf6   : > { %v1876_v40 = vpop.xlane.xlu1 %1875 }
 0xbf7   : > { %v1878_v41 = vmul.f32 %v1872_v39, %v1872_v39  ;;  %v1877_v42 = vmul.f32 0.03125, %v1876_v40  ;;  %v1880_v46 = vsub.f32 %v1868_v30, %v1872_v39 }
 0xbf9   : > { %v1879_v6 = vsub.f32 %v1877_v42, %v1878_v41 }
 0xbfb   : > { %v1881_v44 = vadd.f32 1e-05, %v1879_v6 }
 0xbfd   : > { %2683 = vrsqrt.f32 %v1881_v44 }
 0xc0a   : > { %v2684_v47 = vpop.eup %2683 }
 0xc0b   : > { %v1883_v50 = vmul.f32 %v2684_v47, %v1880_v46 }
 0xc0d   : > { %v1888_v51 = vmul.f32 %v1887_v45, %v1883_v50 }
 0xc0f   : > { %v1893_v52 = vadd.f32 %v1892_v49, %v1888_v51 }
 0xc11   : > { %v1894_v53 = vpack.c.bf16 %v1893_v52, %v1893_v52 }
 0xc13   : > { %2532 = vmatmul.mubr.msk.bf16.vlgmr.msra.gmra.mxu0 %vm462_vm2, %v1894_v53 }
 0xcd3   : > { %v1948_v57 = vpop.f32.mrf.mxu0 }
 0xcd4   : > { %v1949_v58 = vadd.f32 %v1948_v57, %v1898_v15 }
 0xcd5   : > { %v2533_v59 = vpop.f32.mrf.mxu0 }
 0xcd6   : > { %v1954_v0 = vmax.f32 %v1949_v58, 0.0 }
 0xcd7   : > { %v1951_v60 = vpop.f32.mrf.mxu0 }
 0xcd8   : > { %v1955_v62 = vpack.c.bf16 %v1954_v0, %v1954_v0 }
 0xcd9   : > { %v2534_v63 = vpop.f32.mrf.mxu0 }
 0xcda   : > { %2544 = vmatmul.mubr.msk.bf16.vlgmr.msra.gmra.mxu1 %vm1984_vm7, %v1955_v62 }
 0xd9a   : > { %v2022_v2 = vpop.f32.mrf.mxu1 }
 0xd9b   : > { %v2023_v1 = vadd.f32 %v2022_v2, %v1959_v48 }
 0xd9c   : > { %v2545_v3 = vpop.f32.mrf.mxu1 }
 0xd9d   : > { %v2028_v4 = vadd.f32 %v2023_v1, %v1893_v52 }
 0xd9e   : > { %v2025_v5 = vpop.f32.mrf.mxu1 }
 0xd9f   : > { %v2029_v14 = vsel %vm462_vm2, %v2028_v4, 0.0  ;;  %v2033_v8 = vmul.f32 %v2028_v4, %v2028_v4 }
 0xda0   : > { %2030 = vadd.xlane.f32.xlu0 %v2029_v14  ;;  %v2546_v9 = vpop.f32.mrf.mxu1 }
 0xda1   : > { %v2034_v10 = vsel %vm462_vm2, %v2033_v8, 0.0 }
 0xda4   : > { %2035 = vadd.xlane.f32.xlu0 %v2034_v10 }
 0xe29   : > { %v2031_v7 = vpop.xlane.xlu0 %2030 }
 0xe2a   : > { %v2032_v16 = vmul.f32 0.03125, %v2031_v7 }
 0xe2c   : > { %v2038_v18 = vmul.f32 %v2032_v16, %v2032_v16  ;;  %v2040_v22 = vsub.f32 %v2028_v4, %v2032_v16 }
 0xe2d   : > { %v2036_v17 = vpop.xlane.xlu0 %2035 }
 0xe2e   : > { %v2037_v19 = vmul.f32 0.03125, %v2036_v17 }
 0xe30   : > { %v2039_v20 = vsub.f32 %v2037_v19, %v2038_v18 }
 0xe32   : > { %v2041_v12 = vadd.f32 1e-05, %v2039_v20 }
 0xe34   : > { %2685 = vrsqrt.f32 %v2041_v12 }
 0xe41   : > { %v2686_v23 = vpop.eup %2685 }
 0xe42   : > { %v2043_v26 = vmul.f32 %v2686_v23, %v2040_v22 }
 0xe44   : > { %v2048_v27 = vmul.f32 %v2047_v21, %v2043_v26  ;;  %2058 = sbr.rel (%p2295_p2) target bundleno = 3827 (0xef3), region = 56 }
 0xe46   : > { %v2053_v28 = vadd.f32 %v2052_v24, %v2048_v27 }
 0xe48   : > { %2054 = vst.msk [vmem:[#allocation2] sm:$0xff] %vm462_vm2, %v2053_v28 }
 0xe49   : > { %v2061_v29 = vsel %vm462_vm2, %v2053_v28, 0.0  ;;  %v2065_v30 = vmul.f32 %v2053_v28, %v2053_v28  ;;  %v2296_v37 = vld [vmem:[%s3285_s6] ss:$0 sm:$0xff]  ;;  %v2297_v38 = vld [vmem:[%s3285_s6 + $0x1] ss:$0 sm:$0xff] }
 0xe4a   : > { %2062 = vadd.xlane.f32.xlu0 %v2061_v29 }
 0xe4b   : > { %v2066_v43 = vsel %vm462_vm2, %v2065_v30, 0.0 }
 0xe4e   : > { %2067 = vadd.xlane.f32.xlu0 %v2066_v43 }
 0xed3   : > { %v2063_v31 = vpop.xlane.xlu0 %2062 }
 0xed4   : > { %v2064_v11 = vmul.f32 0.03125, %v2063_v31 }
 0xed6   : > { %v2070_v54 = vmul.f32 %v2064_v11, %v2064_v11  ;;  %v2072_v35 = vsub.f32 %v2053_v28, %v2064_v11 }
 0xed7   : > { %v2068_v32 = vpop.xlane.xlu0 %2067 }
 0xed8   : > { %v2069_v25 = vmul.f32 0.03125, %v2068_v32 }
 0xeda   : > { %v2071_v33 = vsub.f32 %v2069_v25, %v2070_v54 }
 0xedc   : > { %v2073_v34 = vadd.f32 1e-05, %v2071_v33 }
 0xede   : > { %2687 = vrsqrt.f32 %v2073_v34 }
 0xeeb   : > { %v2688_v36 = vpop.eup %2687 }
 0xeec   : > { %v2075_v13 = vmul.f32 %v2688_v36, %v2072_v35 }
 0xeee   : > { %v2080_v61 = vmul.f32 %v2296_v37, %v2075_v13 }
 0xef0   : > { %v2085_v39 = vadd.f32 %v2297_v38, %v2080_v61 }
 0xef2   : > { %2086 = vst.msk [vmem:[%s356_s29] sm:$0xff] %vm462_vm2, %v2085_v39 }
 0xef3 PF: > { %s2299_s18 = sshll.u32 %s2769_s28, 7  ;;  %s2101_s23 = sshll.u32 %s356_s29, 4  ;;  %s2102_s23 = int_to_ptr.vmem [resolvable:$true] %s2101_s23 }
 0xef4   : > { %s2099_s21 = scalar_lea.hbm %s3286_s7, %s2299_s18  ;;  %s3309_s9 = sand.u32 1, %s2757_s25  }
 0xef5   : > { %s2088_s22 = scalar_lea.sflag [#allocation4], %s3309_s9  ;;  %s2689_s20 = scalar_lea.vmem %s2102_s23, 128 }
 0xef6   : > { %p2690_p4 = scmp.ne.s32.totalorder %s2102_s23, %s2689_s20  ;;  %s2791_s15 = smov [#allocation3]  }
 0xef7   : > { %s2693_s24 = sshll.u32 %s2791_s15, 4  ;;  %s2694_s24 = int_to_ptr.vmem [resolvable:$false] %s2693_s24 }
 0xef8   : > { %p2691_p5 = pnand %p2690_p4, %p2881_p3  ;;  %s2695_s26 = scalar_lea.vmem %s2694_s24, 256 }
 0xef9   : > { %p2696_p7 = scmp.lt.s32.totalorder %s2102_s23, %s2694_s24  ;;  %p2697_p8 = scmp.lt.s32.totalorder %s2695_s26, %s2689_s20 }
 0xefa   : > { %p2692_p6 = pneg %p2691_p5 }
 0xefb   : > { %p2698_p10 = por %p2697_p8, %p2696_p7 }
 0xefd   : > { %p2699_p11 = pnand %p2698_p10, %p2692_p6 }
 0xeff   : > { %2702 = shalt.err (!%p2699_p11)
}
 0xf00   : > { %s2703_s28 = scalar_lea.hbm %s2099_s21, 128  ;;  %s2707_s30 = scalar_lea.hbm %s3286_s7, 256 }
 0xf01   : > { %p2704_p12 = scmp.ne.s32.totalorder %s2099_s21, %s2703_s28  ;;  %p2708_p1 = scmp.lt.s32.totalorder %s2099_s21, %s3286_s7 }
 0xf02   : > { %p2709_p2 = scmp.lt.s32.totalorder %s2707_s30, %s2703_s28 }
 0xf03   : > { %p2705_p13 = pnand %p2704_p12, %p2881_p3 }
 0xf04   : > { %p2710_p4 = por %p2709_p2, %p2708_p1 }
 0xf05   : > { %p2706_p0 = pneg %p2705_p13 }
 0xf07   : > { %p2711_p5 = pnand %p2710_p4, %p2706_p0 }
 0xf09   : > { %2714 = shalt.err (!%p2711_p5)
}
 0xf0a   : > { %2548 = dma.vmem_to_hbm [thread:$0]  (%p2881_p3), %s2102_s23, 128, %s2099_s21, %s2088_s22  }
 0xf0b PF: > { %s3310_s12 = sld [smem:[#allocation10_spill]] }
 0xf0c   : > { %s3311_s0 = sld [smem:[#allocation6_spill]] }
 0xf11   : > { %p2554_p6 = scmp.ge.s32.totalorder %s3310_s12, 2 }
 0xf12   : > { %s2113_s14 = sand.u32 1, %s3311_s0  }
 0xf13   : > { %p2551_p7 = pnand %p2554_p6, %p2891_p9  ;;  %s2114_s17 = scalar_lea.sflag [#allocation4], %s2113_s14 }
 0xf15   : > { %p2552_p8 = pneg %p2551_p7 }
 0xf17   : > { %2748 = dma.done.wait (%p2552_p8), %s2114_s17, 128  }
 0xf18   : > { %2750 = vsyncadd (%p2552_p8), %s2114_s17, 4294967168  ;;  %s20_s8 = sadd.s32 1, %s3310_s12   ;;  %s3313_s18 = sld [smem:[#allocation7_spill]] }
 0xf19   : > { %p17_p10 = scmp.ge.s32.totalorder %s20_s8, 6   ;;  %s3314_s26 = sld [smem:[#allocation14_spill]] }
 0xf1a   : > { %s3315_s27 = sld [smem:[#allocation8_spill]]  ;;  %s3319_s24 = smov %s2757_s25 }
 0xf1b   : > { %s3316_s28 = sld [smem:[#allocation9_spill]]  ;;  %19 = sbr.rel (!%p17_p10) target bundleno = 7 (0x7), region = 106 }
 0xf1c   : > { %s3317_s29 = sld [smem:[#allocation11_spill]] }
 0xf1d   : > { %s3318_s30 = sld [smem:[#allocation12_spill]] }
 0xf1e   : > { %s3320_s25 = smov %s3313_s18 }
 0xf20   :  { %2119 = vsyncpa [#allocation4], 1 }
 0xf21   :  { %2121 = vsyncpa [#allocation4 + $0x1], 1 }

</bundles_post_ra>
